<compile_context>
chip_gen: v5e
topology: v5e:2x2
jax: 0.10.0
libtpu: 0.0.40
codegen_flags: <defaults>
</compile_context>

<pallas_src>
import functools

import jax
import jax.numpy as jnp
from jax import lax
from jax.experimental import pallas as pl
from jax.experimental.pallas import tpu as pltpu


def _down_kernel(x_ref, w1_ref, b1_ref, w2_ref, b2_ref, o_ref, pad2_ref,
                 *, bn, hb, wh, cin, cmid, cout):
    """Fused double (3x3 conv + folded BN + ReLU) on one (batch, row) block.

    x_ref   : (bn, hb+4, wh+2, Cin)  pooled activations (matmul_dtype), padded
                                     by 1 in W and by a 2-row H halo; halo rows
                                     of interior row blocks hold real neighbour
                                     rows (duplicated by the wrapper).
    w1_ref  : (9*Cin, Cmid)          conv1 weights (BN folded), (dy,dx,ci) rows
    b1_ref  : (1, Cmid)   f32
    w2_ref  : (9*Cmid, Cout)
    b2_ref  : (1, Cout)   f32
    o_ref   : (bn, hb, wh, Cout)     f32 output block (Cout minor -> lane-dense
                                     whenever Cout is a multiple of 128)
    pad2_ref: VMEM (bn, hb+2, wh+2, Cmid) matmul_dtype scratch: conv1 output
              with a 1-pixel halo, staged for conv2.
    """
    j = pl.program_id(1)
    last_j = pl.num_programs(1) - 1
    m1 = bn * (hb + 2) * wh          # conv1 rows (incl. the 1-row conv2 halo)
    m2 = bn * hb * wh                # conv2 / output rows
    taps = [(dy, dx) for dy in range(3) for dx in range(3)]
    dt = pad2_ref.dtype

    # ---- Conv1 (+folded BN) + ReLU: 9 accumulating MXU dots (K = Cin) -------
    # Computed on hb+2 rows so conv2 has its top/bottom halo without any
    # cross-block communication (the 2 extra rows per block are recomputed).
    acc1 = jnp.zeros((m1, cmid), jnp.float32)
    for t, (dy, dx) in enumerate(taps):
        win = x_ref[:, dy:dy + hb + 2, dx:dx + wh, :].reshape(m1, cin)
        acc1 = acc1 + jnp.dot(win, w1_ref[t * cin:(t + 1) * cin, :],
                              preferred_element_type=jnp.float32)
    y1 = jnp.maximum(acc1 + b1_ref[...], 0.0)

    # ---- Stage conv1 output (zero-padded) for conv2 --------------------------
    # Every element of pad2 is rewritten every grid step (safe for any grid
    # order / megacore sharding).  The top & bottom halo rows contain real
    # neighbour values for interior row blocks and are zeroed only at the
    # image border.
    # TODO(synk): the interior store starts at sublane offset 1 (masked store);
    #             a W-aligned staging layout would make it an unmasked store.
    pad2_ref[:, :, 1:wh + 1, :] = y1.reshape(bn, hb + 2, wh, cmid).astype(dt)
    pad2_ref[:, :, 0:1, :] = jnp.zeros((bn, hb + 2, 1, cmid), dt)
    pad2_ref[:, :, wh + 1:wh + 2, :] = jnp.zeros((bn, hb + 2, 1, cmid), dt)

    @pl.when(j == 0)
    def _zero_top():
        pad2_ref[:, 0:1, :, :] = jnp.zeros((bn, 1, wh + 2, cmid), dt)

    @pl.when(j == last_j)
    def _zero_bottom():
        pad2_ref[:, hb + 1:hb + 2, :, :] = jnp.zeros((bn, 1, wh + 2, cmid), dt)

    # ---- Conv2 (+folded BN) + ReLU: 9 accumulating MXU dots (K = Cmid) -------
    acc2 = jnp.zeros((m2, cout), jnp.float32)
    for t, (dy, dx) in enumerate(taps):
        win = pad2_ref[:, dy:dy + hb, dx:dx + wh, :].reshape(m2, cmid)
        acc2 = acc2 + jnp.dot(win, w2_ref[t * cmid:(t + 1) * cmid, :],
                              preferred_element_type=jnp.float32)
    y2 = jnp.maximum(acc2 + b2_ref[...], 0.0)
    o_ref[...] = y2.reshape(bn, hb, wh, cout).astype(o_ref.dtype)


def _vmem_limit_bytes():
    """Scoped-VMEM limit: ~3/4 of physical, capped at 100 MiB (defaults are only
    ~16 MiB on v5e / 32 MiB on v6e & v7x)."""
    try:
        cap = pltpu.get_tpu_info().vmem_capacity_bytes
        return int(min(100 * 1024 * 1024, (cap * 3) // 4))
    except Exception:  # capability probe only -- never hides kernel errors
        return 32 * 1024 * 1024


def _divisors(k):
    return [d for d in range(1, k + 1) if k % d == 0]


def _pick_tile(n, hh, wh, cin, cmid, cout, dtype):
    """Pick (batch block bn, row block hb) so the working set fits the scoped
    VMEM budget (v7x ~48 MiB vs ~96 MiB on v5e/v6e), the MXU M dimension is
    well filled, and there are >= 2 grid steps whenever the shape allows
    (both TensorCores on v7x + input/output pipelining)."""
    limit = _vmem_limit_bytes()
    budget = int(0.55 * limit)                 # headroom for Mosaic temporaries
    target_rows = 4096 if limit >= 80 * 1024 * 1024 else 2048
    dsz = jnp.dtype(dtype).itemsize

    def vmem_cost(bn, hb):
        m1 = bn * (hb + 2) * wh
        m2 = bn * hb * wh
        x_blk = 2 * bn * (hb + 4) * (wh + 2) * cin * dsz      # double-buffered
        o_blk = 2 * m2 * cout * 4                             # f32, double-buffered
        wts = 2 * 9 * (cin * cmid + cmid * cout) * dsz        # weights (x2 buffers)
        pad2 = bn * (hb + 2) * (wh + 2) * cmid * dsz          # staging scratch
        acc = m1 * cmid * 4 + m2 * cout * 4                   # f32 accumulators
        win = 2 * m1 * max(cin, cmid) * dsz                   # window temporaries
        return x_blk + o_blk + wts + pad2 + acc + win

    cands = [(bn, hb) for bn in _divisors(n) for hb in _divisors(hh)]
    fits = [c for c in cands if vmem_cost(*c) <= budget]
    if not fits:
        fits = [min(cands, key=lambda c: vmem_cost(*c))]

    def score(c):
        bn, hb = c
        steps = (n // bn) * (hh // hb)
        m2 = bn * hb * wh
        # Prefer: >=2 grid steps, then a full MXU M dimension, then packing
        # whole images (bn) before splitting rows (hb) -> less halo recompute.
        return (steps >= 2, min(m2, target_rows), bn, hb)

    return max(fits, key=score)


def down_pallas(x_nchw, w1_hwio, b1, w2_hwio, b2, *,
                matmul_dtype=jnp.bfloat16, batch_block=None, row_block=None):
    """Down.forward: (N, Cin, H, W) -> (N, Cout, H//2, W//2).  Pure / jittable.

    matmul_dtype=bfloat16 (default) runs the MXU in native bf16 with f32
    accumulation; pass jnp.float32 to match PyTorch f32 numerics exactly.
    """
    n, cin, h, w = x_nchw.shape
    assert h % 2 == 0 and w % 2 == 0, "MaxPool2d(2) path assumes even H, W"
    hh, wh = h // 2, w // 2
    cmid = w1_hwio.shape[-1]
    cout = w2_hwio.shape[-1]

    bn, hb = _pick_tile(n, hh, wh, cin, cmid, cout, matmul_dtype)
    if batch_block is not None:
        bn = batch_block
    if row_block is not None:
        hb = row_block
    assert n % bn == 0 and hh % hb == 0
    n_rb = hh // hb
    n_bb = n // bn

    # --- XLA-side prep (memory-bound, fused by XLA) ---------------------------
    # NCHW -> NHWC in matmul_dtype, 2x2 max-pool via reshape+max (exact in bf16),
    # zero-pad by (2,2) rows / (1,1) cols, then stack the overlapping (hb+4)-row
    # slabs so each grid step reads a standard non-overlapping block.
    # TODO(synk): check in HLO that pool + pad + stack fuse into a single pass.
    x_nhwc = jnp.transpose(x_nchw, (0, 2, 3, 1)).astype(matmul_dtype)
    pooled = x_nhwc.reshape(n, hh, 2, wh, 2, cin).max(axis=(2, 4))
    pooled_pad = jnp.pad(pooled, ((0, 0), (2, 2), (1, 1), (0, 0)))
    xb = jnp.stack([pooled_pad[:, r * hb:r * hb + hb + 4] for r in range(n_rb)],
                   axis=0)                       # (n_rb, N, hb+4, wh+2, Cin)
    xb = xb.reshape(n_rb * n, hb + 4, wh + 2, cin)

    # Conv weights as (9*C, Cout) matrices; (dy, dx, ci) row order matches the
    # per-tap slices inside the kernel.  BN is already folded by the caller.
    w1_2d = w1_hwio.reshape(9 * cin, cmid).astype(matmul_dtype)
    w2_2d = w2_hwio.reshape(9 * cmid, cout).astype(matmul_dtype)
    b1_2d = b1.reshape(1, cmid).astype(jnp.float32)
    b2_2d = b2.reshape(1, cout).astype(jnp.float32)

    in_specs = [
        pl.BlockSpec((bn, hb + 4, wh + 2, cin),
                     lambda i, j: (j * n_bb + i, 0, 0, 0)),
        pl.BlockSpec((9 * cin, cmid), lambda i, j: (0, 0)),
        pl.BlockSpec((1, cmid), lambda i, j: (0, 0)),
        pl.BlockSpec((9 * cmid, cout), lambda i, j: (0, 0)),
        pl.BlockSpec((1, cout), lambda i, j: (0, 0)),
    ]
    out_spec = pl.BlockSpec((bn, hb, wh, cout), lambda i, j: (i, j, 0, 0))

    kern = functools.partial(_down_kernel, bn=bn, hb=hb, wh=wh,
                             cin=cin, cmid=cmid, cout=cout)
    dsz = jnp.dtype(matmul_dtype).itemsize
    cost = pl.CostEstimate(
        flops=2 * n * hh * wh * 9 * (cin * cmid + cmid * cout),
        transcendentals=0,
        bytes_accessed=(xb.size * dsz
                        + (w1_2d.size + w2_2d.size) * dsz
                        + (b1_2d.size + b2_2d.size) * 4
                        + n * hh * wh * cout * 4))

    out = pl.pallas_call(
        kern,
        out_shape=jax.ShapeDtypeStruct((n, hh, wh, cout), jnp.float32),
        grid_spec=pltpu.PrefetchScalarGridSpec(
            num_scalar_prefetch=0,
            grid=(n_bb, n_rb),
            in_specs=in_specs,
            out_specs=out_spec,
            scratch_shapes=[
                pltpu.VMEM((bn, hb + 2, wh + 2, cmid), matmul_dtype),
            ],
        ),
        compiler_params=pltpu.CompilerParams(
            dimension_semantics=("parallel", "parallel"),
            vmem_limit_bytes=_vmem_limit_bytes(),
        ),
        cost_estimate=cost,
    )(xb, w1_2d, b1_2d, w2_2d, b2_2d)

    return jnp.transpose(out, (0, 3, 1, 2))      # NHWC -> NCHW


def down_reference(x_nchw, w1_hwio, b1, w2_hwio, b2):
    """Pure-JAX reference (maxpool + SAME conv + bias + ReLU, twice)."""
    x = jnp.transpose(x_nchw, (0, 2, 3, 1))
    x = lax.reduce_window(x, -jnp.inf, lax.max,
                          (1, 2, 2, 1), (1, 2, 2, 1), "VALID")

    def conv_bn_relu(h, w, b):
        y = lax.conv_general_dilated(
            h, w, window_strides=(1, 1), padding="SAME",
            dimension_numbers=("NHWC", "HWIO", "NHWC"))
        return jnp.maximum(y + b, 0.0)

    x = conv_bn_relu(x, w1_hwio, b1)
    x = conv_bn_relu(x, w2_hwio, b2)
    return jnp.transpose(x, (0, 3, 1, 2))


def make_params(key, in_channels, out_channels):
    """Deterministic synthetic parameters; BN (eval mode) folded into conv w/b."""
    mid_channels = out_channels
    k1, k2, k3, k4 = jax.random.split(key, 4)
    w1 = jax.random.normal(k1, (3, 3, in_channels, mid_channels), jnp.float32) * 0.1
    b1 = jax.random.normal(k2, (mid_channels,), jnp.float32) * 0.1
    w2 = jax.random.normal(k3, (3, 3, mid_channels, out_channels), jnp.float32) * 0.1
    b2 = jax.random.normal(k4, (out_channels,), jnp.float32) * 0.1

    # BatchNorm2d eval-mode fold: gamma=1, beta=0, running_mean=0, running_var=1.
    eps = 1e-5
    scale = 1.0 / jnp.sqrt(1.0 + eps)
    return w1 * scale, b1 * scale, w2 * scale, b2 * scale


if __name__ == "__main__":
    key = jax.random.PRNGKey(0)
    kx, kp = jax.random.split(key)

    N, Cin, H, W = 2, 4, 16, 16
    Cout = 8
    x = jax.random.normal(kx, (N, Cin, H, W), jnp.float32)
    w1, b1, w2, b2 = make_params(kp, Cin, Cout)

    ref = jax.block_until_ready(down_reference(x, w1, b1, w2, b2))

    # Exact-precision path (f32 MXU): must match the f32 reference tightly.
    f32_fn = jax.jit(functools.partial(down_pallas, matmul_dtype=jnp.float32))
    out_f32 = jax.block_until_ready(f32_fn(x, w1, b1, w2, b2))
    assert out_f32.shape == (N, Cout, H // 2, W // 2), out_f32.shape
    if not jnp.allclose(out_f32, ref, atol=1e-4, rtol=1e-4):
        raise AssertionError("f32 Pallas kernel does not match JAX reference")

    # Forced row-block tiling (bn=1, hb=4 -> grid (2, 2)): exercises the
    # inter-row-block conv2 halo path at this tiny size.
    rb_fn = jax.jit(functools.partial(down_pallas, matmul_dtype=jnp.float32,
                                      batch_block=1, row_block=4))
    out_rb = jax.block_until_ready(rb_fn(x, w1, b1, w2, b2))
    if not jnp.allclose(out_rb, ref, atol=1e-4, rtol=1e-4):
        raise AssertionError("row-blocked Pallas kernel does not match reference")

    # Default bf16 MXU path (f32 accumulation): looser tolerance vs the f32 ref.
    bf16_fn = jax.jit(down_pallas)
    out_bf16 = jax.block_until_ready(bf16_fn(x, w1, b1, w2, b2))
    if not jnp.allclose(out_bf16, ref, atol=5e-2, rtol=5e-2):
        raise AssertionError("bf16 Pallas kernel deviates too much from reference")

    print("KERNEL_OK")
</pallas_src>

<mosaic_0001>
module attributes {stable_mosaic.version = 11 : i64} {
  func.func @_down_kernel(%arg0: i32, %arg1: i32, %arg2: memref<2x8x10x4xf32, #tpu.memory_space<vmem>>, %arg3: memref<36x8xf32, #tpu.memory_space<vmem>>, %arg4: memref<1x8xf32, #tpu.memory_space<vmem>>, %arg5: memref<72x8xf32, #tpu.memory_space<vmem>>, %arg6: memref<1x8xf32, #tpu.memory_space<vmem>>, %arg7: memref<2x4x8x8xf32, #tpu.memory_space<vmem>>, %arg8: memref<2x6x10x8xf32, #tpu.memory_space<vmem>>) attributes {dimension_semantics = [#tpu.dimension_semantics<parallel>, #tpu.dimension_semantics<parallel>], iteration_bounds = array<i64: 1, 2>, scalar_prefetch = 0 : i64, scratch_operands = 1 : i64, tpu.core_type = #tpu.core_type<tc>, window_params = [{transform_indices = @transform_0, window_bounds = array<i64: 2, 8, 10, 4>}, {pipeline_mode = #tpu.pipeline_mode<synchronous>, transform_indices = @transform_1, window_bounds = array<i64: 36, 8>}, {pipeline_mode = #tpu.pipeline_mode<synchronous>, transform_indices = @transform_2, window_bounds = array<i64: 1, 8>}, {pipeline_mode = #tpu.pipeline_mode<synchronous>, transform_indices = @transform_3, window_bounds = array<i64: 72, 8>}, {pipeline_mode = #tpu.pipeline_mode<synchronous>, transform_indices = @transform_4, window_bounds = array<i64: 1, 8>}, {transform_indices = @transform_5, window_bounds = array<i64: 2, 4, 8, 8>}]} {
    %cst = arith.constant 0.000000e+00 : f32
    %0 = vector.broadcast %cst : f32 to vector<96x8xf32>
    %c0 = arith.constant 0 : index
    %c0_0 = arith.constant 0 : index
    %c0_1 = arith.constant 0 : index
    %c0_2 = arith.constant 0 : index
    %1 = vector.load %arg2[%c0, %c0_0, %c0_1, %c0_2] : memref<2x8x10x4xf32, #tpu.memory_space<vmem>>, vector<2x6x8x4xf32>
    %2 = vector.shape_cast %1 : vector<2x6x8x4xf32> to vector<96x4xf32>
    %c0_3 = arith.constant 0 : index
    %c0_4 = arith.constant 0 : index
    %3 = vector.load %arg3[%c0_3, %c0_4] : memref<36x8xf32, #tpu.memory_space<vmem>>, vector<4x8xf32>
    %cst_5 = arith.constant dense<0.000000e+00> : vector<96x8xf32>
    %4 = tpu.matmul %2, %3, %cst_5 {dimension_numbers = #tpu.dot_dimension_numbers<[1], [0], [0], [1], [0, 0, 1, 1], [], []>} : vector<96x4xf32>, vector<4x8xf32>, vector<96x8xf32> -> vector<96x8xf32>
    %5 = arith.addf %0, %4 : vector<96x8xf32>
    %c0_6 = arith.constant 0 : index
    %c0_7 = arith.constant 0 : index
    %c1 = arith.constant 1 : index
    %c0_8 = arith.constant 0 : index
    %6 = vector.load %arg2[%c0_6, %c0_7, %c1, %c0_8] : memref<2x8x10x4xf32, #tpu.memory_space<vmem>>, vector<2x6x8x4xf32>
    %7 = vector.shape_cast %6 : vector<2x6x8x4xf32> to vector<96x4xf32>
    %c4 = arith.constant 4 : index
    %c0_9 = arith.constant 0 : index
    %8 = vector.load %arg3[%c4, %c0_9] : memref<36x8xf32, #tpu.memory_space<vmem>>, vector<4x8xf32>
    %cst_10 = arith.constant dense<0.000000e+00> : vector<96x8xf32>
    %9 = tpu.matmul %7, %8, %cst_10 {dimension_numbers = #tpu.dot_dimension_numbers<[1], [0], [0], [1], [0, 0, 1, 1], [], []>} : vector<96x4xf32>, vector<4x8xf32>, vector<96x8xf32> -> vector<96x8xf32>
    %10 = arith.addf %5, %9 : vector<96x8xf32>
    %c0_11 = arith.constant 0 : index
    %c0_12 = arith.constant 0 : index
    %c2 = arith.constant 2 : index
    %c0_13 = arith.constant 0 : index
    %11 = vector.load %arg2[%c0_11, %c0_12, %c2, %c0_13] : memref<2x8x10x4xf32, #tpu.memory_space<vmem>>, vector<2x6x8x4xf32>
    %12 = vector.shape_cast %11 : vector<2x6x8x4xf32> to vector<96x4xf32>
    %c8 = arith.constant 8 : index
    %c0_14 = arith.constant 0 : index
    %13 = vector.load %arg3[%c8, %c0_14] : memref<36x8xf32, #tpu.memory_space<vmem>>, vector<4x8xf32>
    %cst_15 = arith.constant dense<0.000000e+00> : vector<96x8xf32>
    %14 = tpu.matmul %12, %13, %cst_15 {dimension_numbers = #tpu.dot_dimension_numbers<[1], [0], [0], [1], [0, 0, 1, 1], [], []>} : vector<96x4xf32>, vector<4x8xf32>, vector<96x8xf32> -> vector<96x8xf32>
    %15 = arith.addf %10, %14 : vector<96x8xf32>
    %c0_16 = arith.constant 0 : index
    %c1_17 = arith.constant 1 : index
    %c0_18 = arith.constant 0 : index
    %c0_19 = arith.constant 0 : index
    %16 = vector.load %arg2[%c0_16, %c1_17, %c0_18, %c0_19] : memref<2x8x10x4xf32, #tpu.memory_space<vmem>>, vector<2x6x8x4xf32>
    %17 = vector.shape_cast %16 : vector<2x6x8x4xf32> to vector<96x4xf32>
    %c12 = arith.constant 12 : index
    %c0_20 = arith.constant 0 : index
    %18 = vector.load %arg3[%c12, %c0_20] : memref<36x8xf32, #tpu.memory_space<vmem>>, vector<4x8xf32>
    %cst_21 = arith.constant dense<0.000000e+00> : vector<96x8xf32>
    %19 = tpu.matmul %17, %18, %cst_21 {dimension_numbers = #tpu.dot_dimension_numbers<[1], [0], [0], [1], [0, 0, 1, 1], [], []>} : vector<96x4xf32>, vector<4x8xf32>, vector<96x8xf32> -> vector<96x8xf32>
    %20 = arith.addf %15, %19 : vector<96x8xf32>
    %c0_22 = arith.constant 0 : index
    %c1_23 = arith.constant 1 : index
    %c1_24 = arith.constant 1 : index
    %c0_25 = arith.constant 0 : index
    %21 = vector.load %arg2[%c0_22, %c1_23, %c1_24, %c0_25] : memref<2x8x10x4xf32, #tpu.memory_space<vmem>>, vector<2x6x8x4xf32>
    %22 = vector.shape_cast %21 : vector<2x6x8x4xf32> to vector<96x4xf32>
    %c16 = arith.constant 16 : index
    %c0_26 = arith.constant 0 : index
    %23 = vector.load %arg3[%c16, %c0_26] : memref<36x8xf32, #tpu.memory_space<vmem>>, vector<4x8xf32>
    %cst_27 = arith.constant dense<0.000000e+00> : vector<96x8xf32>
    %24 = tpu.matmul %22, %23, %cst_27 {dimension_numbers = #tpu.dot_dimension_numbers<[1], [0], [0], [1], [0, 0, 1, 1], [], []>} : vector<96x4xf32>, vector<4x8xf32>, vector<96x8xf32> -> vector<96x8xf32>
    %25 = arith.addf %20, %24 : vector<96x8xf32>
    %c0_28 = arith.constant 0 : index
    %c1_29 = arith.constant 1 : index
    %c2_30 = arith.constant 2 : index
    %c0_31 = arith.constant 0 : index
    %26 = vector.load %arg2[%c0_28, %c1_29, %c2_30, %c0_31] : memref<2x8x10x4xf32, #tpu.memory_space<vmem>>, vector<2x6x8x4xf32>
    %27 = vector.shape_cast %26 : vector<2x6x8x4xf32> to vector<96x4xf32>
    %c20 = arith.constant 20 : index
    %c0_32 = arith.constant 0 : index
    %28 = vector.load %arg3[%c20, %c0_32] : memref<36x8xf32, #tpu.memory_space<vmem>>, vector<4x8xf32>
    %cst_33 = arith.constant dense<0.000000e+00> : vector<96x8xf32>
    %29 = tpu.matmul %27, %28, %cst_33 {dimension_numbers = #tpu.dot_dimension_numbers<[1], [0], [0], [1], [0, 0, 1, 1], [], []>} : vector<96x4xf32>, vector<4x8xf32>, vector<96x8xf32> -> vector<96x8xf32>
    %30 = arith.addf %25, %29 : vector<96x8xf32>
    %c0_34 = arith.constant 0 : index
    %c2_35 = arith.constant 2 : index
    %c0_36 = arith.constant 0 : index
    %c0_37 = arith.constant 0 : index
    %31 = vector.load %arg2[%c0_34, %c2_35, %c0_36, %c0_37] : memref<2x8x10x4xf32, #tpu.memory_space<vmem>>, vector<2x6x8x4xf32>
    %32 = vector.shape_cast %31 : vector<2x6x8x4xf32> to vector<96x4xf32>
    %c24 = arith.constant 24 : index
    %c0_38 = arith.constant 0 : index
    %33 = vector.load %arg3[%c24, %c0_38] : memref<36x8xf32, #tpu.memory_space<vmem>>, vector<4x8xf32>
    %cst_39 = arith.constant dense<0.000000e+00> : vector<96x8xf32>
    %34 = tpu.matmul %32, %33, %cst_39 {dimension_numbers = #tpu.dot_dimension_numbers<[1], [0], [0], [1], [0, 0, 1, 1], [], []>} : vector<96x4xf32>, vector<4x8xf32>, vector<96x8xf32> -> vector<96x8xf32>
    %35 = arith.addf %30, %34 : vector<96x8xf32>
    %c0_40 = arith.constant 0 : index
    %c2_41 = arith.constant 2 : index
    %c1_42 = arith.constant 1 : index
    %c0_43 = arith.constant 0 : index
    %36 = vector.load %arg2[%c0_40, %c2_41, %c1_42, %c0_43] : memref<2x8x10x4xf32, #tpu.memory_space<vmem>>, vector<2x6x8x4xf32>
    %37 = vector.shape_cast %36 : vector<2x6x8x4xf32> to vector<96x4xf32>
    %c28 = arith.constant 28 : index
    %c0_44 = arith.constant 0 : index
    %38 = vector.load %arg3[%c28, %c0_44] : memref<36x8xf32, #tpu.memory_space<vmem>>, vector<4x8xf32>
    %cst_45 = arith.constant dense<0.000000e+00> : vector<96x8xf32>
    %39 = tpu.matmul %37, %38, %cst_45 {dimension_numbers = #tpu.dot_dimension_numbers<[1], [0], [0], [1], [0, 0, 1, 1], [], []>} : vector<96x4xf32>, vector<4x8xf32>, vector<96x8xf32> -> vector<96x8xf32>
    %40 = arith.addf %35, %39 : vector<96x8xf32>
    %c0_46 = arith.constant 0 : index
    %c2_47 = arith.constant 2 : index
    %c2_48 = arith.constant 2 : index
    %c0_49 = arith.constant 0 : index
    %41 = vector.load %arg2[%c0_46, %c2_47, %c2_48, %c0_49] : memref<2x8x10x4xf32, #tpu.memory_space<vmem>>, vector<2x6x8x4xf32>
    %42 = vector.shape_cast %41 : vector<2x6x8x4xf32> to vector<96x4xf32>
    %c32 = arith.constant 32 : index
    %c0_50 = arith.constant 0 : index
    %43 = vector.load %arg3[%c32, %c0_50] : memref<36x8xf32, #tpu.memory_space<vmem>>, vector<4x8xf32>
    %cst_51 = arith.constant dense<0.000000e+00> : vector<96x8xf32>
    %44 = tpu.matmul %42, %43, %cst_51 {dimension_numbers = #tpu.dot_dimension_numbers<[1], [0], [0], [1], [0, 0, 1, 1], [], []>} : vector<96x4xf32>, vector<4x8xf32>, vector<96x8xf32> -> vector<96x8xf32>
    %45 = arith.addf %40, %44 : vector<96x8xf32>
    %c0_52 = arith.constant 0 : index
    %c0_53 = arith.constant 0 : index
    %46 = vector.load %arg4[%c0_52, %c0_53] : memref<1x8xf32, #tpu.memory_space<vmem>>, vector<1x8xf32>
    %47 = vector.broadcast %46 : vector<1x8xf32> to vector<96x8xf32>
    %48 = arith.addf %45, %47 : vector<96x8xf32>
    %cst_54 = arith.constant 0.000000e+00 : f32
    %49 = vector.broadcast %cst_54 : f32 to vector<96x8xf32>
    %50 = arith.maximumf %48, %49 : vector<96x8xf32>
    %51 = vector.shape_cast %50 : vector<96x8xf32> to vector<2x6x8x8xf32>
    %c0_55 = arith.constant 0 : index
    %c0_56 = arith.constant 0 : index
    %c1_57 = arith.constant 1 : index
    %c0_58 = arith.constant 0 : index
    %52 = vector.load %arg8[%c0_55, %c0_56, %c1_57, %c0_58] : memref<2x6x10x8xf32, #tpu.memory_space<vmem>>, vector<2x6x8x8xf32>
    tpu.vector_store %arg8[%c0_55, %c0_56, %c1_57, %c0_58], %51 {strides = array<i32>} : memref<2x6x10x8xf32, #tpu.memory_space<vmem>>, vector<2x6x8x8xf32>,
    %cst_59 = arith.constant 0.000000e+00 : f32
    %53 = vector.broadcast %cst_59 : f32 to vector<2x6x1x8xf32>
    %c0_60 = arith.constant 0 : index
    %c0_61 = arith.constant 0 : index
    %c0_62 = arith.constant 0 : index
    %c0_63 = arith.constant 0 : index
    %54 = vector.load %arg8[%c0_60, %c0_61, %c0_62, %c0_63] : memref<2x6x10x8xf32, #tpu.memory_space<vmem>>, vector<2x6x1x8xf32>
    tpu.vector_store %arg8[%c0_60, %c0_61, %c0_62, %c0_63], %53 {strides = array<i32>} : memref<2x6x10x8xf32, #tpu.memory_space<vmem>>, vector<2x6x1x8xf32>,
    %cst_64 = arith.constant 0.000000e+00 : f32
    %55 = vector.broadcast %cst_64 : f32 to vector<2x6x1x8xf32>
    %c0_65 = arith.constant 0 : index
    %c0_66 = arith.constant 0 : index
    %c9 = arith.constant 9 : index
    %c0_67 = arith.constant 0 : index
    %56 = vector.load %arg8[%c0_65, %c0_66, %c9, %c0_67] : memref<2x6x10x8xf32, #tpu.memory_space<vmem>>, vector<2x6x1x8xf32>
    tpu.vector_store %arg8[%c0_65, %c0_66, %c9, %c0_67], %55 {strides = array<i32>} : memref<2x6x10x8xf32, #tpu.memory_space<vmem>>, vector<2x6x1x8xf32>,
    %c0_i32 = arith.constant 0 : i32
    %57 = arith.cmpi eq, %arg1, %c0_i32 : i32
    %58 = arith.extui %57 : i1 to i32
    %c0_i32_68 = arith.constant 0 : i32
    %59 = arith.cmpi ne, %58, %c0_i32_68 : i32
    scf.if %59 {
      %cst_137 = arith.constant 0.000000e+00 : f32
      %116 = vector.broadcast %cst_137 : f32 to vector<2x1x10x8xf32>
      %c0_138 = arith.constant 0 : index
      %c0_139 = arith.constant 0 : index
      %c0_140 = arith.constant 0 : index
      %c0_141 = arith.constant 0 : index
      %117 = vector.load %arg8[%c0_138, %c0_139, %c0_140, %c0_141] : memref<2x6x10x8xf32, #tpu.memory_space<vmem>>, vector<2x1x10x8xf32>
      tpu.vector_store %arg8[%c0_138, %c0_139, %c0_140, %c0_141], %116 {strides = array<i32>} : memref<2x6x10x8xf32, #tpu.memory_space<vmem>>, vector<2x1x10x8xf32>,
    } else {
    }
    %c1_i32 = arith.constant 1 : i32
    %60 = arith.cmpi eq, %arg1, %c1_i32 : i32
    %61 = arith.extui %60 : i1 to i32
    %c0_i32_69 = arith.constant 0 : i32
    %62 = arith.cmpi ne, %61, %c0_i32_69 : i32
    scf.if %62 {
      %cst_137 = arith.constant 0.000000e+00 : f32
      %116 = vector.broadcast %cst_137 : f32 to vector<2x1x10x8xf32>
      %c0_138 = arith.constant 0 : index
      %c5 = arith.constant 5 : index
      %c0_139 = arith.constant 0 : index
      %c0_140 = arith.constant 0 : index
      %117 = vector.load %arg8[%c0_138, %c5, %c0_139, %c0_140] : memref<2x6x10x8xf32, #tpu.memory_space<vmem>>, vector<2x1x10x8xf32>
      tpu.vector_store %arg8[%c0_138, %c5, %c0_139, %c0_140], %116 {strides = array<i32>} : memref<2x6x10x8xf32, #tpu.memory_space<vmem>>, vector<2x1x10x8xf32>,
    } else {
    }
    %cst_70 = arith.constant 0.000000e+00 : f32
    %63 = vector.broadcast %cst_70 : f32 to vector<64x8xf32>
    %c0_71 = arith.constant 0 : index
    %c0_72 = arith.constant 0 : index
    %c0_73 = arith.constant 0 : index
    %c0_74 = arith.constant 0 : index
    %64 = vector.load %arg8[%c0_71, %c0_72, %c0_73, %c0_74] : memref<2x6x10x8xf32, #tpu.memory_space<vmem>>, vector<2x4x8x8xf32>
    %65 = vector.shape_cast %64 : vector<2x4x8x8xf32> to vector<64x8xf32>
    %c0_75 = arith.constant 0 : index
    %c0_76 = arith.constant 0 : index
    %66 = vector.load %arg5[%c0_75, %c0_76] : memref<72x8xf32, #tpu.memory_space<vmem>>, vector<8x8xf32>
    %cst_77 = arith.constant dense<0.000000e+00> : vector<64x8xf32>
    %67 = tpu.matmul %65, %66, %cst_77 {dimension_numbers = #tpu.dot_dimension_numbers<[1], [0], [0], [1], [0, 0, 1, 1], [], []>} : vector<64x8xf32>, vector<8x8xf32>, vector<64x8xf32> -> vector<64x8xf32>
    %68 = arith.addf %63, %67 : vector<64x8xf32>
    %c0_78 = arith.constant 0 : index
    %c0_79 = arith.constant 0 : index
    %c1_80 = arith.constant 1 : index
    %c0_81 = arith.constant 0 : index
    %69 = vector.load %arg8[%c0_78, %c0_79, %c1_80, %c0_81] : memref<2x6x10x8xf32, #tpu.memory_space<vmem>>, vector<2x4x8x8xf32>
    %70 = vector.shape_cast %69 : vector<2x4x8x8xf32> to vector<64x8xf32>
    %c8_82 = arith.constant 8 : index
    %c0_83 = arith.constant 0 : index
    %71 = vector.load %arg5[%c8_82, %c0_83] : memref<72x8xf32, #tpu.memory_space<vmem>>, vector<8x8xf32>
    %cst_84 = arith.constant dense<0.000000e+00> : vector<64x8xf32>
    %72 = tpu.matmul %70, %71, %cst_84 {dimension_numbers = #tpu.dot_dimension_numbers<[1], [0], [0], [1], [0, 0, 1, 1], [], []>} : vector<64x8xf32>, vector<8x8xf32>, vector<64x8xf32> -> vector<64x8xf32>
    %73 = arith.addf %68, %72 : vector<64x8xf32>
    %c0_85 = arith.constant 0 : index
    %c0_86 = arith.constant 0 : index
    %c2_87 = arith.constant 2 : index
    %c0_88 = arith.constant 0 : index
    %74 = vector.load %arg8[%c0_85, %c0_86, %c2_87, %c0_88] : memref<2x6x10x8xf32, #tpu.memory_space<vmem>>, vector<2x4x8x8xf32>
    %75 = vector.shape_cast %74 : vector<2x4x8x8xf32> to vector<64x8xf32>
    %c16_89 = arith.constant 16 : index
    %c0_90 = arith.constant 0 : index
    %76 = vector.load %arg5[%c16_89, %c0_90] : memref<72x8xf32, #tpu.memory_space<vmem>>, vector<8x8xf32>
    %cst_91 = arith.constant dense<0.000000e+00> : vector<64x8xf32>
    %77 = tpu.matmul %75, %76, %cst_91 {dimension_numbers = #tpu.dot_dimension_numbers<[1], [0], [0], [1], [0, 0, 1, 1], [], []>} : vector<64x8xf32>, vector<8x8xf32>, vector<64x8xf32> -> vector<64x8xf32>
    %78 = arith.addf %73, %77 : vector<64x8xf32>
    %c0_92 = arith.constant 0 : index
    %c1_93 = arith.constant 1 : index
    %c0_94 = arith.constant 0 : index
    %c0_95 = arith.constant 0 : index
    %79 = vector.load %arg8[%c0_92, %c1_93, %c0_94, %c0_95] : memref<2x6x10x8xf32, #tpu.memory_space<vmem>>, vector<2x4x8x8xf32>
    %80 = vector.shape_cast %79 : vector<2x4x8x8xf32> to vector<64x8xf32>
    %c24_96 = arith.constant 24 : index
    %c0_97 = arith.constant 0 : index
    %81 = vector.load %arg5[%c24_96, %c0_97] : memref<72x8xf32, #tpu.memory_space<vmem>>, vector<8x8xf32>
    %cst_98 = arith.constant dense<0.000000e+00> : vector<64x8xf32>
    %82 = tpu.matmul %80, %81, %cst_98 {dimension_numbers = #tpu.dot_dimension_numbers<[1], [0], [0], [1], [0, 0, 1, 1], [], []>} : vector<64x8xf32>, vector<8x8xf32>, vector<64x8xf32> -> vector<64x8xf32>
    %83 = arith.addf %78, %82 : vector<64x8xf32>
    %c0_99 = arith.constant 0 : index
    %c1_100 = arith.constant 1 : index
    %c1_101 = arith.constant 1 : index
    %c0_102 = arith.constant 0 : index
    %84 = vector.load %arg8[%c0_99, %c1_100, %c1_101, %c0_102] : memref<2x6x10x8xf32, #tpu.memory_space<vmem>>, vector<2x4x8x8xf32>
    %85 = vector.shape_cast %84 : vector<2x4x8x8xf32> to vector<64x8xf32>
    %c32_103 = arith.constant 32 : index
    %c0_104 = arith.constant 0 : index
    %86 = vector.load %arg5[%c32_103, %c0_104] : memref<72x8xf32, #tpu.memory_space<vmem>>, vector<8x8xf32>
    %cst_105 = arith.constant dense<0.000000e+00> : vector<64x8xf32>
    %87 = tpu.matmul %85, %86, %cst_105 {dimension_numbers = #tpu.dot_dimension_numbers<[1], [0], [0], [1], [0, 0, 1, 1], [], []>} : vector<64x8xf32>, vector<8x8xf32>, vector<64x8xf32> -> vector<64x8xf32>
    %88 = arith.addf %83, %87 : vector<64x8xf32>
    %c0_106 = arith.constant 0 : index
    %c1_107 = arith.constant 1 : index
    %c2_108 = arith.constant 2 : index
    %c0_109 = arith.constant 0 : index
    %89 = vector.load %arg8[%c0_106, %c1_107, %c2_108, %c0_109] : memref<2x6x10x8xf32, #tpu.memory_space<vmem>>, vector<2x4x8x8xf32>
    %90 = vector.shape_cast %89 : vector<2x4x8x8xf32> to vector<64x8xf32>
    %c40 = arith.constant 40 : index
    %c0_110 = arith.constant 0 : index
    %91 = vector.load %arg5[%c40, %c0_110] : memref<72x8xf32, #tpu.memory_space<vmem>>, vector<8x8xf32>
    %cst_111 = arith.constant dense<0.000000e+00> : vector<64x8xf32>
    %92 = tpu.matmul %90, %91, %cst_111 {dimension_numbers = #tpu.dot_dimension_numbers<[1], [0], [0], [1], [0, 0, 1, 1], [], []>} : vector<64x8xf32>, vector<8x8xf32>, vector<64x8xf32> -> vector<64x8xf32>
    %93 = arith.addf %88, %92 : vector<64x8xf32>
    %c0_112 = arith.constant 0 : index
    %c2_113 = arith.constant 2 : index
    %c0_114 = arith.constant 0 : index
    %c0_115 = arith.constant 0 : index
    %94 = vector.load %arg8[%c0_112, %c2_113, %c0_114, %c0_115] : memref<2x6x10x8xf32, #tpu.memory_space<vmem>>, vector<2x4x8x8xf32>
    %95 = vector.shape_cast %94 : vector<2x4x8x8xf32> to vector<64x8xf32>
    %c48 = arith.constant 48 : index
    %c0_116 = arith.constant 0 : index
    %96 = vector.load %arg5[%c48, %c0_116] : memref<72x8xf32, #tpu.memory_space<vmem>>, vector<8x8xf32>
    %cst_117 = arith.constant dense<0.000000e+00> : vector<64x8xf32>
    %97 = tpu.matmul %95, %96, %cst_117 {dimension_numbers = #tpu.dot_dimension_numbers<[1], [0], [0], [1], [0, 0, 1, 1], [], []>} : vector<64x8xf32>, vector<8x8xf32>, vector<64x8xf32> -> vector<64x8xf32>
    %98 = arith.addf %93, %97 : vector<64x8xf32>
    %c0_118 = arith.constant 0 : index
    %c2_119 = arith.constant 2 : index
    %c1_120 = arith.constant 1 : index
    %c0_121 = arith.constant 0 : index
    %99 = vector.load %arg8[%c0_118, %c2_119, %c1_120, %c0_121] : memref<2x6x10x8xf32, #tpu.memory_space<vmem>>, vector<2x4x8x8xf32>
    %100 = vector.shape_cast %99 : vector<2x4x8x8xf32> to vector<64x8xf32>
    %c56 = arith.constant 56 : index
    %c0_122 = arith.constant 0 : index
    %101 = vector.load %arg5[%c56, %c0_122] : memref<72x8xf32, #tpu.memory_space<vmem>>, vector<8x8xf32>
    %cst_123 = arith.constant dense<0.000000e+00> : vector<64x8xf32>
    %102 = tpu.matmul %100, %101, %cst_123 {dimension_numbers = #tpu.dot_dimension_numbers<[1], [0], [0], [1], [0, 0, 1, 1], [], []>} : vector<64x8xf32>, vector<8x8xf32>, vector<64x8xf32> -> vector<64x8xf32>
    %103 = arith.addf %98, %102 : vector<64x8xf32>
    %c0_124 = arith.constant 0 : index
    %c2_125 = arith.constant 2 : index
    %c2_126 = arith.constant 2 : index
    %c0_127 = arith.constant 0 : index
    %104 = vector.load %arg8[%c0_124, %c2_125, %c2_126, %c0_127] : memref<2x6x10x8xf32, #tpu.memory_space<vmem>>, vector<2x4x8x8xf32>
    %105 = vector.shape_cast %104 : vector<2x4x8x8xf32> to vector<64x8xf32>
    %c64 = arith.constant 64 : index
    %c0_128 = arith.constant 0 : index
    %106 = vector.load %arg5[%c64, %c0_128] : memref<72x8xf32, #tpu.memory_space<vmem>>, vector<8x8xf32>
    %cst_129 = arith.constant dense<0.000000e+00> : vector<64x8xf32>
    %107 = tpu.matmul %105, %106, %cst_129 {dimension_numbers = #tpu.dot_dimension_numbers<[1], [0], [0], [1], [0, 0, 1, 1], [], []>} : vector<64x8xf32>, vector<8x8xf32>, vector<64x8xf32> -> vector<64x8xf32>
    %108 = arith.addf %103, %107 : vector<64x8xf32>
    %c0_130 = arith.constant 0 : index
    %c0_131 = arith.constant 0 : index
    %109 = vector.load %arg6[%c0_130, %c0_131] : memref<1x8xf32, #tpu.memory_space<vmem>>, vector<1x8xf32>
    %110 = vector.broadcast %109 : vector<1x8xf32> to vector<64x8xf32>
    %111 = arith.addf %108, %110 : vector<64x8xf32>
    %cst_132 = arith.constant 0.000000e+00 : f32
    %112 = vector.broadcast %cst_132 : f32 to vector<64x8xf32>
    %113 = arith.maximumf %111, %112 : vector<64x8xf32>
    %114 = vector.shape_cast %113 : vector<64x8xf32> to vector<2x4x8x8xf32>
    %c0_133 = arith.constant 0 : index
    %c0_134 = arith.constant 0 : index
    %c0_135 = arith.constant 0 : index
    %c0_136 = arith.constant 0 : index
    %115 = vector.load %arg7[%c0_133, %c0_134, %c0_135, %c0_136] : memref<2x4x8x8xf32, #tpu.memory_space<vmem>>, vector<2x4x8x8xf32>
    tpu.vector_store %arg7[%c0_133, %c0_134, %c0_135, %c0_136], %114 {strides = array<i32>} : memref<2x4x8x8xf32, #tpu.memory_space<vmem>>, vector<2x4x8x8xf32>,
    return
  }
  func.func @transform_0(%arg0: i32, %arg1: i32) -> (i32, i32, i32, i32) {
    %c1_i32 = arith.constant 1 : i32
    %0 = arith.muli %arg1, %c1_i32 : i32
    %1 = arith.addi %0, %arg0 : i32
    %c0_i32 = arith.constant 0 : i32
    %c0_i32_0 = arith.constant 0 : i32
    %c0_i32_1 = arith.constant 0 : i32
    %c0_i32_2 = arith.constant 0 : i32
    return %1, %c0_i32, %c0_i32_0, %c0_i32_1 : i32, i32, i32, i32
  }
  func.func @transform_1(%arg0: i32, %arg1: i32) -> (i32, i32) {
    %c0_i32 = arith.constant 0 : i32
    %c0_i32_0 = arith.constant 0 : i32
    %c0_i32_1 = arith.constant 0 : i32
    return %c0_i32, %c0_i32_0 : i32, i32
  }
  func.func @transform_2(%arg0: i32, %arg1: i32) -> (i32, i32) {
    %c0_i32 = arith.constant 0 : i32
    %c0_i32_0 = arith.constant 0 : i32
    %c0_i32_1 = arith.constant 0 : i32
    return %c0_i32, %c0_i32_0 : i32, i32
  }
  func.func @transform_3(%arg0: i32, %arg1: i32) -> (i32, i32) {
    %c0_i32 = arith.constant 0 : i32
    %c0_i32_0 = arith.constant 0 : i32
    %c0_i32_1 = arith.constant 0 : i32
    return %c0_i32, %c0_i32_0 : i32, i32
  }
  func.func @transform_4(%arg0: i32, %arg1: i32) -> (i32, i32) {
    %c0_i32 = arith.constant 0 : i32
    %c0_i32_0 = arith.constant 0 : i32
    %c0_i32_1 = arith.constant 0 : i32
    return %c0_i32, %c0_i32_0 : i32, i32
  }
  func.func @transform_5(%arg0: i32, %arg1: i32) -> (i32, i32, i32, i32) {
    %c0_i32 = arith.constant 0 : i32
    %c0_i32_0 = arith.constant 0 : i32
    %c0_i32_1 = arith.constant 0 : i32
    return %arg0, %arg1, %c0_i32, %c0_i32_0 : i32, i32, i32, i32
  }
}

</mosaic_0001>

<bundles_post_ra>
// kernel: down_pallas.1
= control target key start
LH: loop header
LB: loop body
LE: loop exit
PB: predicated region body
PF: predicated region fallthrough
CT: control target
= control target key end

     0   :  { %s2653_s18 = smov 0   ;;  %s2655_s19 = smov 0   ;;  %s3382_s0 = inlined_call_operand.vmem [shape: f32[4,8,10,4], index: 0, kind: input, shape index: {}]   ;;  %s3383_s1 = inlined_call_operand.vmem [shape: f32[36,8], index: 1, kind: input, shape index: {}]   ;;  %s3384_s2 = inlined_call_operand.vmem [shape: f32[1,8], index: 2, kind: input, shape index: {}]   ;;  %s3385_s3 = inlined_call_operand.vmem [shape: f32[72,8], index: 3, kind: input, shape index: {}]   ;;  %s3386_s4 = inlined_call_operand.vmem [shape: f32[1,8], index: 4, kind: input, shape index: {}]   ;;  %s3387_s5 = inlined_call_operand.vmem [shape: f32[2,8,8,8], index: 5, kind: output, shape index: {}]  }
   0x1   :  { %s2657_s20 = smov 0   ;;  %s2659_s21 = smov 0  }
   0x2   :  { %s2661_s22 = smov 0  }
   0x3 LB: > { %s2253_s23 = sadd.s32 4294967295, %s2618_s22   ;;  %s24_s24 = sadd.s32 1, %s2614_s21  ;;  %s2618_s22 = sphi %s2661_s22, %s15_s22   ;;  %s2614_s21 = sphi %s2659_s21, %s3392_s21   ;;  %s2610_s20 = sphi %s2657_s20, %s3391_s20   ;;  %s2606_s19 = sphi %s2655_s19, %s3390_s19   ;;  %s2602_s18 = sphi %s2653_s18, %s3389_s18  }
   0x4   : > { %p25_p0 = scmp.ge.s32.totalorder %s24_s24, 2  ;;  %s148_s25 = sadd.s32 1, %s2606_s19 }
   0x5   : > { %p158_p1 = scmp.ne.s32.totalorder %s2606_s19, %s2602_s18  ;;  %p159_p2 = scmp.eq.s32.totalorder %s2253_s23, 1 }
   0x6   : > { %s3394_s24 = smov (%p25_p0, %s24_s24), 0  ;;  %p2257_p4 = scmp.ge.s32.totalorder %s2618_s22, 1 }
   0x7   : > { %p2682_p3 = por %p159_p2, %p158_p1  ;;  %s144_s27 = ssub.s32 %s2614_s21, %s3394_s24 }
   0x8   : > { %p207_p5 = scmp.lt.s32.totalorder %s2618_s22, 3  ;;  %p146_p6 = scmp.eq.s32.totalorder %s144_s27, 0 }
   0xa   : > { %p208_p7 = pnand %p2257_p4, %p207_p5 }
   0xb   : > { %s2691_s28 = scalar_select %p146_p6, %s2606_s19, %s148_s25  }
   0xc   : > { %211 = sbr.rel (%p208_p7) target bundleno = 793 (0x319), region = 40  ;;  %s233_s29 = sand.u32 (!%p208_p7), 1, %s2602_s18  }
   0xd   : > { %s2699_s9 = sshll.u32 (!%p208_p7), %s233_s29, 6  ;;  %s2259_s12 = sshll.u32 (!%p208_p7), %s2610_s20, 1 }
   0xe   : > { %p238_p8 = scmp.lt.s32.totalorder (!%p208_p7), %s2259_s12, 3  ;;  %s3123_s14 = scalar_lea.vmem (!%p208_p7), [#allocation3], %s2699_s9 }
   0xf   : > { %p2451_p9 = scmp.ne.s32.totalorder (!%p208_p7), %s2610_s20, 0 }
  0x11   : > { %v272_v0 = vld [vmem:[%s3383_s1 + $0x4] sm:$0xf]  ;;  %vm310_vm0 = vcmask 1043456   ;;  %v259_v1 = vld [vmem:[%s3383_s1] sm:$0xf]  ;;  %s3396_s12 = smov (!%p238_p8, %s2259_s12), 3 }
  0x12   : > { %2262 = vmatpush.msk.msra.mxu0 %vm310_vm0, %v272_v0  ;;  %2533 = vmatpush.msk.msra.mxu3 %vm310_vm0, %v259_v1  ;;  %v471_v2 = vld [vmem:[%s3383_s1 + $0x8] sm:$0xf]  ;;  %s2530_s13 = sshll.u32 %s3396_s12, 7  ;;  %vm273_vm1 = vcmask 31744   ;;  %v589_v9 = vld [vmem:[%s3383_s1 + $0xc] sm:$0xf] }
  0x13   : > { %2288 = vmatpush.msk.msra.mxu2 %vm310_vm0, %v471_v2  ;;  %2532 = vmatpush.msk.msra.mxu1 %vm310_vm0, %v259_v1  ;;  %s2714_s16 = scalar_lea.vmem %s3382_s0, %s2530_s13  ;;  %v706_v36 = vld [vmem:[%s3383_s1 + $0x10] sm:$0xf]  ;;  %v1058_v37 = vld [vmem:[%s3383_s1 + $0x1c] sm:$0xf]  ;;  %v941_v38 = vld [vmem:[%s3383_s1 + $0x18] sm:$0xf] }
  0x14   : > { %2275 = vmatpush.msk.msrb.mxu0 %vm310_vm0, %v259_v1  ;;  %2534 = vmatpush.msk.msrb.mxu3 %vm310_vm0, %v471_v2  ;;  %v260_v3 = vld [vmem:[%s2714_s16 + $0x1] sm:$0xff]  ;;  %v248_v6 = vld [vmem:[%s2714_s16 + $0x10] sm:$0xff]  ;;  %vm1308_vm2 = vcmask 64512   ;;  %vm1321_vm3 = vcmask 57344  }
  0x15   : > { %v2718_v4 = vld [vmem:[%s2714_s16 + $0xc0] sm:$0xff]  ;;  %2263 = vmatmul.msk.f32.vlgmr.msra.gmra.mxu0 %vm273_vm1, %v260_v3  ;;  %2277 = vmatmul.msk.f32.vlgmr.msra.gmra.mxu1 %vm273_vm1, %v248_v6  ;;  %v2728_v7 = vld [vmem:[%s2714_s16 + $0x11] sm:$0xff] }
  0x16   : > { %v459_v5 = vld [vmem:[%s2714_s16 + $0x2] sm:$0xff]  ;;  %2286 = vmatmul.msk.f32.vlgmr.msra.gmra.mxu3 %vm273_vm1, %v2718_v4  ;;  %v2731_v8 = vld [vmem:[%s2714_s16 + $0xd0] sm:$0xff]  ;;  %2338 = vmatpush.msk.msra.mxu0 %vm310_vm0, %v706_v36 }
  0x17   : > { %2289 = vmatmul.msk.f32.vlgmr.msra.gmra.mxu2 %vm273_vm1, %v459_v5  ;;  %v2737_v10 = vld [vmem:[%s2714_s16 + $0x12] sm:$0xff]  ;;  %v2740_v11 = vld [vmem:[%s2714_s16 + $0x20] sm:$0xff]  ;;  %2313 = vmatpush.msk.msra.mxu3 %vm310_vm0, %v589_v9 }
  0x18   : > { %v2752_v12 = vld [vmem:[%s2714_s16 + $0x21] sm:$0xff]  ;;  %v2755_v13 = vld [vmem:[%s2714_s16 + $0xb2] sm:$0xff]  ;;  %2388 = vmatpush.msk.msrb.mxu2 %vm310_vm0, %v941_v38 }
  0x19   : > { %v2758_v14 = vld [vmem:[%s2714_s16 + $0x22] sm:$0xff]  ;;  %v2761_v15 = vld [vmem:[%s2714_s16 + $0x30] sm:$0xff] }
  0x1a   : > { %v2772_v16 = vld [vmem:[%s2714_s16 + $0x31] sm:$0xff]  ;;  %v2775_v17 = vld [vmem:[%s2714_s16 + $0xc2] sm:$0xff] }
  0x1b   : > { %v2778_v18 = vld [vmem:[%s2714_s16 + $0x32] sm:$0xff]  ;;  %v2781_v19 = vld [vmem:[%s2714_s16 + $0x40] sm:$0xff] }
  0x1c   : > { %v2792_v20 = vld [vmem:[%s2714_s16 + $0x41] sm:$0xff]  ;;  %v2795_v21 = vld [vmem:[%s2714_s16 + $0xd2] sm:$0xff] }
  0x1d   : > { %2264 = vmatmul.msk.f32.gmra.mxu0 %vm273_vm1, %v2728_v7  ;;  %2278 = vmatmul.msk.f32.gmra.mxu1 %vm273_vm1, %v2740_v11  ;;  %v2798_v22 = vld [vmem:[%s2714_s16 + $0x42] sm:$0xff]  ;;  %v252_v23 = vld [vmem:[%s2714_s16 + $0x50] sm:$0xff] }
  0x1e   : > { %2287 = vmatmul.msk.f32.gmra.mxu3 %vm273_vm1, %v2731_v8  ;;  %v2809_v24 = vld [vmem:[%s2714_s16 + $0x51] sm:$0xff]  ;;  %v253_v26 = vld [vmem:[%s2714_s16 + $0x80] sm:$0xff] }
  0x1f   : > { %2290 = vmatmul.msk.f32.gmra.mxu2 %vm273_vm1, %v2737_v10  ;;  %v2812_v25 = vld [vmem:[%s2714_s16 + $0x52] sm:$0xff]  ;;  %v266_v27 = vld [vmem:[%s2714_s16 + $0x81] sm:$0xff] }
  0x20   : > { %v465_v28 = vld [vmem:[%s2714_s16 + $0x82] sm:$0xff]  ;;  %v254_v29 = vld [vmem:[%s2714_s16 + $0x90] sm:$0xff] }
  0x21   : > { %v2830_v30 = vld [vmem:[%s2714_s16 + $0x91] sm:$0xff]  ;;  %v255_v32 = vld [vmem:[%s2714_s16 + $0xa0] sm:$0xff] }
  0x22   : > { %v466_v31 = vld [vmem:[%s2714_s16 + $0x92] sm:$0xff]  ;;  %v2841_v33 = vld [vmem:[%s2714_s16 + $0xa1] sm:$0xff] }
  0x23   : > { %v2844_v34 = vld [vmem:[%s2714_s16 + $0xa2] sm:$0xff]  ;;  %v256_v35 = vld [vmem:[%s2714_s16 + $0xb0] sm:$0xff] }
  0x24   : > { %v2867_v39 = vld [vmem:[%s2714_s16 + $0xb1] sm:$0xff]  ;;  %v2881_v41 = vld [vmem:[%s2714_s16 + $0xc1] sm:$0xff] }
  0x25   : > { %2265 = vmatmul.msk.f32.gmra.mxu0 %vm273_vm1, %v2752_v12  ;;  %2279 = vmatmul.msk.f32.gmra.mxu1 %vm273_vm1, %v2761_v15  ;;  %v823_v40 = vld [vmem:[%s3383_s1 + $0x14] sm:$0xf]  ;;  %v2306_v42 = vld [vmem:[%s2714_s16 + $0x60] sm:$0xff] }
  0x26   : > { %2298 = vmatmul.msk.f32.vlgmr.msrb.gmra.mxu3 %vm273_vm1, %v2755_v13  ;;  %2363 = vmatpush.msk.msrb.mxu1 %vm310_vm0, %v823_v40  ;;  %v2892_v43 = vld [vmem:[%s2714_s16 + $0xd1] sm:$0xff]  ;;  %v247_v44 = vld [vmem:[%s2714_s16] sm:$0xff] }
  0x27   : > { %2291 = vmatmul.msk.f32.gmra.mxu2 %vm273_vm1, %v2758_v14  ;;  %2413 = vmatpush.msk.msrb.mxu3 %vm310_vm0, %v1058_v37  ;;  %v1175_v45 = vld [vmem:[%s3383_s1 + $0x20] sm:$0xf]  ;;  %v2381_v46 = vld [vmem:[%s2714_s16 + $0x70] sm:$0xff] }
  0x28   : > { %v2923_v47 = vld [vmem:[%s2714_s16 + $0x62] sm:$0xff] }
  0x29   : > { %v2312_v49 = vld [vmem:[%s2714_s16 + $0xe0] sm:$0xff] }
  0x2a   : > { %v2331_v60 = vld [vmem:[%s2714_s16 + $0x61] sm:$0xff] }
  0x2d   : > { %2266 = vmatmul.msk.f32.gmra.mxu0 %vm273_vm1, %v2772_v16  ;;  %2280 = vmatmul.msk.f32.gmra.mxu1 %vm273_vm1, %v2781_v19 }
  0x2e   : > { %2299 = vmatmul.msk.f32.gmra.mxu3 %vm273_vm1, %v2775_v17 }
  0x2f   : > { %2292 = vmatmul.msk.f32.gmra.mxu2 %vm273_vm1, %v2778_v18 }
  0x35   : > { %2267 = vmatmul.msk.f32.gmra.mxu0 %vm273_vm1, %v2792_v20  ;;  %2281 = vmatmul.msk.f32.gmra.mxu1 %vm273_vm1, %v252_v23 }
  0x36   : > { %2300 = vmatmul.msk.f32.gmra.mxu3 %vm273_vm1, %v2795_v21 }
  0x37   : > { %2293 = vmatmul.msk.f32.gmra.mxu2 %vm273_vm1, %v2798_v22 }
  0x3d   : > { %2268 = vmatmul.msk.f32.gmra.mxu0 %vm273_vm1, %v2809_v24  ;;  %2282 = vmatmul.msk.f32.gmra.mxu1 %vm273_vm1, %v253_v26 }
  0x3e   : > { %2314 = vmatmul.msk.f32.vlgmr.msra.gmra.mxu3 %vm273_vm1, %v248_v6 }
  0x3f   : > { %2294 = vmatmul.msk.f32.gmra.mxu2 %vm273_vm1, %v2812_v25 }
  0x45   : > { %2269 = vmatmul.msk.f32.gmra.mxu0 %vm273_vm1, %v266_v27  ;;  %2283 = vmatmul.msk.f32.gmra.mxu1 %vm273_vm1, %v254_v29 }
  0x46   : > { %2315 = vmatmul.msk.f32.gmra.mxu3 %vm273_vm1, %v2740_v11 }
  0x47   : > { %2295 = vmatmul.msk.f32.gmra.mxu2 %vm273_vm1, %v465_v28 }
  0x4d   : > { %2270 = vmatmul.msk.f32.gmra.mxu0 %vm273_vm1, %v2830_v30  ;;  %2284 = vmatmul.msk.f32.gmra.mxu1 %vm273_vm1, %v255_v32 }
  0x4e   : > { %2316 = vmatmul.msk.f32.gmra.mxu3 %vm273_vm1, %v2761_v15 }
  0x4f   : > { %2296 = vmatmul.msk.f32.gmra.mxu2 %vm273_vm1, %v466_v31 }
  0x55   : > { %2271 = vmatmul.msk.f32.gmra.mxu0 %vm273_vm1, %v2841_v33  ;;  %2285 = vmatmul.msk.f32.gmra.mxu1 %vm273_vm1, %v256_v35 }
  0x56   : > { %2317 = vmatmul.msk.f32.gmra.mxu3 %vm273_vm1, %v2781_v19 }
  0x57   : > { %2297 = vmatmul.msk.f32.gmra.mxu2 %vm273_vm1, %v2844_v34 }
  0x5d   : > { %2272 = vmatmul.msk.f32.gmra.mxu0 %vm273_vm1, %v2867_v39  ;;  %2364 = vmatmul.msk.f32.vlgmr.msrb.gmra.mxu1 %vm273_vm1, %v2737_v10  ;;  %v2387_v10 = vld [vmem:[%s2714_s16 + $0xf0] sm:$0xff] }
  0x5e   : > { %2318 = vmatmul.msk.f32.gmra.mxu3 %vm273_vm1, %v252_v23 }
  0x5f   : > { %2389 = vmatmul.msk.f32.vlgmr.msrb.gmra.mxu2 %vm273_vm1, %v2740_v11  ;;  %v2982_v11 = vld [vmem:[%s2714_s16 + $0xe2] sm:$0xff] }
  0x65   : > { %2273 = vmatmul.msk.f32.gmra.mxu0 %vm273_vm1, %v2881_v41  ;;  %2365 = vmatmul.msk.f32.gmra.mxu1 %vm273_vm1, %v2758_v14 }
  0x66   : > { %2319 = vmatmul.msk.f32.gmra.mxu3 %vm273_vm1, %v2306_v42 }
  0x67   : > { %2390 = vmatmul.msk.f32.gmra.mxu2 %vm273_vm1, %v2761_v15 }
  0x6d   : > { %2274 = vmatmul.msk.f32.gmra.mxu0 %vm273_vm1, %v2892_v43  ;;  %2366 = vmatmul.msk.f32.gmra.mxu1 %vm273_vm1, %v2778_v18 }
  0x6e   : > { %2320 = vmatmul.msk.f32.gmra.mxu3 %vm273_vm1, %v254_v29 }
  0x6f   : > { %2391 = vmatmul.msk.f32.gmra.mxu2 %vm273_vm1, %v2781_v19 }
  0x75   : > { %2276 = vmatmul.msk.f32.vlgmr.msrb.gmra.mxu0 %vm273_vm1, %v247_v44  ;;  %2367 = vmatmul.msk.f32.gmra.mxu1 %vm273_vm1, %v2798_v22 }
  0x76   : > { %2321 = vmatmul.msk.f32.gmra.mxu3 %vm273_vm1, %v255_v32  ;;  %2438 = vmatpush.msk.msrb.mxu0 %vm310_vm0, %v1175_v45 }
  0x77   : > { %2392 = vmatmul.msk.f32.gmra.mxu2 %vm273_vm1, %v252_v23 }
  0x7d   : > { %2339 = vmatmul.msk.f32.vlgmr.msra.gmra.mxu0 %vm273_vm1, %v2728_v7  ;;  %2368 = vmatmul.msk.f32.gmra.mxu1 %vm273_vm1, %v2812_v25 }
  0x7e   : > { %2322 = vmatmul.msk.f32.gmra.mxu3 %vm273_vm1, %v256_v35 }
  0x7f   : > { %2393 = vmatmul.msk.f32.gmra.mxu2 %vm273_vm1, %v2306_v42 }
  0x85   : > { %2340 = vmatmul.msk.f32.gmra.mxu0 %vm273_vm1, %v2752_v12  ;;  %2369 = vmatmul.msk.f32.gmra.mxu1 %vm273_vm1, %v2923_v47 }
  0x86   : > { %2323 = vmatmul.msk.f32.gmra.mxu3 %vm273_vm1, %v2718_v4 }
  0x87   : > { %2394 = vmatmul.msk.f32.gmra.mxu2 %vm273_vm1, %v2381_v46 }
  0x8d   : > { %2341 = vmatmul.msk.f32.gmra.mxu0 %vm273_vm1, %v2772_v16  ;;  %2370 = vmatmul.msk.f32.gmra.mxu1 %vm273_vm1, %v466_v31 }
  0x8e   : > { %2324 = vmatmul.msk.f32.gmra.mxu3 %vm273_vm1, %v2731_v8 }
  0x8f   : > { %2395 = vmatmul.msk.f32.gmra.mxu2 %vm273_vm1, %v255_v32 }
  0x92   : > { %v2934_v48 = vpop.f32.mrf.mxu0  ;;  %v426_v50 = vpop.f32.mrf.mxu1 }
  0x95   : > { %2342 = vmatmul.msk.f32.gmra.mxu0 %vm273_vm1, %v2792_v20  ;;  %2371 = vmatmul.msk.f32.gmra.mxu1 %vm273_vm1, %v2844_v34 }
  0x96   : > { %2325 = vmatmul.msk.f32.gmra.mxu3 %vm273_vm1, %v2312_v49 }
  0x97   : > { %2396 = vmatmul.msk.f32.gmra.mxu2 %vm273_vm1, %v256_v35 }
  0x99   : > { %v2943_v51 = vpop.f32.mrf.mxu3 }
  0x9a   : > { %v2945_v52 = vpop.f32.mrf.mxu2  ;;  %v334_v53 = vpop.f32.mrf.mxu0 }
  0x9b   : > { %v429_v54 = vpop.f32.mrf.mxu1  ;;  %v427_v55 = vadd.f32 %v426_v50, %v334_v53 }
  0x9d   : > { %2343 = vmatmul.msk.f32.gmra.mxu0 %vm273_vm1, %v2809_v24  ;;  %2372 = vmatmul.msk.f32.gmra.mxu1 %vm273_vm1, %v2755_v13 }
  0x9e   : > { %2414 = vmatmul.msk.f32.vlgmr.msrb.gmra.mxu3 %vm273_vm1, %v2752_v12 }
  0x9f   : > { %2397 = vmatmul.msk.f32.gmra.mxu2 %vm273_vm1, %v2718_v4 }
  0xa1   : > { %v2955_v56 = vpop.f32.mrf.mxu3 }
  0xa2   : > { %v531_v57 = vpop.f32.mrf.mxu2  ;;  %v337_v59 = vpop.f32.mrf.mxu0 }
  0xa3   : > { %v565_v58 = vadd.f32 %v531_v57, %v427_v55  ;;  %v432_v61 = vpop.f32.mrf.mxu1  ;;  %v430_v62 = vadd.f32 %v429_v54, %v337_v59  ;;  %v2337_v54 = vld [vmem:[%s2714_s16 + $0xe1] sm:$0xff] }
  0xa5   : > { %2344 = vmatmul.msk.f32.gmra.mxu0 %vm273_vm1, %v2331_v60  ;;  %2373 = vmatmul.msk.f32.gmra.mxu1 %vm273_vm1, %v2775_v17 }
  0xa6   : > { %2415 = vmatmul.msk.f32.gmra.mxu3 %vm273_vm1, %v2772_v16 }
  0xa7   : > { %2398 = vmatmul.msk.f32.gmra.mxu2 %vm273_vm1, %v2731_v8 }
  0xa9   : > { %v2965_v63 = vpop.f32.mrf.mxu3 }
  0xaa   : > { %v534_v0 = vpop.f32.mrf.mxu2  ;;  %v340_v2 = vpop.f32.mrf.mxu0 }
  0xab   : > { %v566_v1 = vadd.f32 %v534_v0, %v430_v62  ;;  %v435_v3 = vpop.f32.mrf.mxu1  ;;  %v433_v4 = vadd.f32 %v432_v61, %v340_v2 }
  0xad   : > { %2345 = vmatmul.msk.f32.gmra.mxu0 %vm273_vm1, %v2830_v30  ;;  %2374 = vmatmul.msk.f32.gmra.mxu1 %vm273_vm1, %v2795_v21  ;;  %v2406_v30 = vld [vmem:[%s2714_s16 + $0x71] sm:$0xff] }
  0xae   : > { %2416 = vmatmul.msk.f32.gmra.mxu3 %vm273_vm1, %v2792_v20 }
  0xaf   : > { %2399 = vmatmul.msk.f32.gmra.mxu2 %vm273_vm1, %v2312_v49 }
  0xb1   : > { %v2974_v5 = vpop.f32.mrf.mxu3 }
  0xb2   : > { %v537_v6 = vpop.f32.mrf.mxu2  ;;  %v343_v8 = vpop.f32.mrf.mxu0 }
  0xb3   : > { %v567_v7 = vadd.f32 %v537_v6, %v433_v4  ;;  %v438_v9 = vpop.f32.mrf.mxu1  ;;  %v436_v12 = vadd.f32 %v435_v3, %v343_v8 }
  0xb5   : > { %2346 = vmatmul.msk.f32.gmra.mxu0 %vm273_vm1, %v2841_v33  ;;  %2375 = vmatmul.msk.f32.gmra.mxu1 %vm273_vm1, %v2982_v11 }
  0xb6   : > { %2417 = vmatmul.msk.f32.gmra.mxu3 %vm273_vm1, %v2809_v24 }
  0xb7   : > { %2400 = vmatmul.msk.f32.gmra.mxu2 %vm273_vm1, %v2387_v10 }
  0xb9   : > { %v2987_v15 = vpop.f32.mrf.mxu3 }
  0xba   : > { %v540_v16 = vpop.f32.mrf.mxu2  ;;  %v346_v20 = vpop.f32.mrf.mxu0 }
  0xbb   : > { %v568_v19 = vadd.f32 %v540_v16, %v436_v12  ;;  %v441_v23 = vpop.f32.mrf.mxu1  ;;  %v439_v24 = vadd.f32 %v438_v9, %v346_v20 }
  0xbd   : > { %2347 = vmatmul.msk.f32.gmra.mxu0 %vm273_vm1, %v2867_v39 }
  0xbe   : > { %2418 = vmatmul.msk.f32.gmra.mxu3 %vm273_vm1, %v2331_v60 }
  0xc1   : > { %v646_v26 = vpop.f32.mrf.mxu3 }
  0xc2   : > { %v543_v27 = vpop.f32.mrf.mxu2  ;;  %v349_v29 = vpop.f32.mrf.mxu0 }
  0xc3   : > { %v569_v28 = vadd.f32 %v543_v27, %v439_v24  ;;  %v444_v31 = vpop.f32.mrf.mxu1  ;;  %v442_v32 = vadd.f32 %v441_v23, %v349_v29  ;;  %v2431_v23 = vld [vmem:[%s2714_s16 + $0x72] sm:$0xff] }
  0xc5   : > { %2348 = vmatmul.msk.f32.gmra.mxu0 %vm273_vm1, %v2881_v41 }
  0xc6   : > { %2419 = vmatmul.msk.f32.gmra.mxu3 %vm273_vm1, %v2406_v30 }
  0xc9   : > { %v649_v35 = vpop.f32.mrf.mxu3 }
  0xca   : > { %v546_v36 = vpop.f32.mrf.mxu2  ;;  %v683_v37 = vadd.f32 %v649_v35, %v565_v58  ;;  %v352_v40 = vpop.f32.mrf.mxu0 }
  0xcb   : > { %v570_v38 = vadd.f32 %v546_v36, %v442_v32  ;;  %v447_v42 = vpop.f32.mrf.mxu1  ;;  %v445_v44 = vadd.f32 %v444_v31, %v352_v40 }
  0xcd   : > { %2349 = vmatmul.msk.f32.gmra.mxu0 %vm273_vm1, %v2892_v43 }
  0xce   : > { %2420 = vmatmul.msk.f32.gmra.mxu3 %vm273_vm1, %v2841_v33 }
  0xd1   : > { %v652_v45 = vpop.f32.mrf.mxu3 }
  0xd2   : > { %v549_v46 = vpop.f32.mrf.mxu2  ;;  %v684_v49 = vadd.f32 %v652_v45, %v566_v1  ;;  %v355_v53 = vpop.f32.mrf.mxu0 }
  0xd3   : > { %v571_v50 = vadd.f32 %v549_v46, %v445_v44  ;;  %v448_v55 = vadd.f32 %v447_v42, %v355_v53  ;;  %v450_v58 = vpop.f32.mrf.mxu1 }
  0xd5   : > { %2350 = vmatmul.msk.f32.gmra.mxu0 %vm273_vm1, %v2337_v54 }
  0xd6   : > { %2421 = vmatmul.msk.f32.gmra.mxu3 %vm273_vm1, %v2867_v39 }
  0xd9   : > { %v655_v57 = vpop.f32.mrf.mxu3 }
  0xda   : > { %v552_v59 = vpop.f32.mrf.mxu2  ;;  %v685_v60 = vadd.f32 %v655_v57, %v567_v7  ;;  %v358_v33 = vpop.f32.mrf.mxu0  ;;  %v2412_v7 = vld [vmem:[%s2714_s16 + $0xf1] sm:$0xff] }
  0xdb   : > { %v572_v61 = vadd.f32 %v552_v59, %v448_v55  ;;  %v451_v62 = vadd.f32 %v450_v58, %v358_v33  ;;  %v880_v44 = vpop.f32.mrf.mxu1 }
  0xdd   : > { %2439 = vmatmul.msk.f32.vlgmr.msrb.gmra.mxu0 %vm273_vm1, %v2758_v14  ;;  %v573_v0 = vadd.f32 %v2965_v63, %v451_v62 }
  0xde   : > { %2422 = vmatmul.msk.f32.gmra.mxu3 %vm273_vm1, %v2881_v41 }
  0xe1   : > { %v658_v1 = vpop.f32.mrf.mxu3 }
  0xe2   : > { %v686_v2 = vadd.f32 %v658_v1, %v568_v19  ;;  %v361_v39 = vpop.f32.mrf.mxu0  ;;  %v998_v46 = vpop.f32.mrf.mxu2 }
  0xe3   : > { %v883_v53 = vpop.f32.mrf.mxu1 }
  0xe5   : > { %2440 = vmatmul.msk.f32.gmra.mxu0 %vm273_vm1, %v2778_v18 }
  0xe6   : > { %2423 = vmatmul.msk.f32.gmra.mxu3 %vm273_vm1, %v2892_v43 }
  0xe9   : > { %v661_v3 = vpop.f32.mrf.mxu3 }
  0xea   : > { %v687_v4 = vadd.f32 %v661_v3, %v569_v28  ;;  %v364_v6 = vpop.f32.mrf.mxu0 }
  0xeb   : > { %v457_v31 = vadd.f32 %v2955_v56, %v364_v6  ;;  %v886_v58 = vpop.f32.mrf.mxu1 }
  0xed   : > { %2441 = vmatmul.msk.f32.gmra.mxu0 %vm273_vm1, %v2798_v22  ;;  %v575_v35 = vadd.f32 %v2987_v15, %v457_v31  ;;  %v2437_v15 = vld [vmem:[%s2714_s16 + $0xf2] sm:$0xff] }
  0xee   : > { %2424 = vmatmul.msk.f32.gmra.mxu3 %vm273_vm1, %v2337_v54  ;;  %v1001_v54 = vpop.f32.mrf.mxu2 }
  0xf1   : > { %v664_v14 = vpop.f32.mrf.mxu3 }
  0xf2   : > { %v688_v41 = vadd.f32 %v664_v14, %v570_v38  ;;  %v423_v63 = vpop.f32.mrf.mxu0 }
  0xf3   : > { %v424_v8 = vadd.f32 %v423_v63, %v2934_v48  ;;  %v889_v1 = vpop.f32.mrf.mxu1 }
  0xf5   : > { %v564_v43 = vadd.f32 %v2945_v52, %v424_v8  ;;  %2442 = vmatmul.msk.f32.gmra.mxu0 %vm273_vm1, %v2812_v25  ;;  %v454_v25 = vadd.f32 %v2943_v51, %v361_v39  ;;  %v3063_v39 = vld [vmem:[%s3384_s2] ss:$0 sm:$0xff] }
  0xf6   : > { %2425 = vmatmul.msk.f32.gmra.mxu3 %vm273_vm1, %v2412_v7  ;;  %v1004_v59 = vpop.f32.mrf.mxu2 }
  0xf7   : > { %v682_v18 = vadd.f32 %v646_v26, %v564_v43  ;;  %v574_v28 = vadd.f32 %v2974_v5, %v454_v25 }
  0xf9   : > { %v667_v9 = vpop.f32.mrf.mxu3 }
  0xfa   : > { %v689_v10 = vadd.f32 %v667_v9, %v571_v50  ;;  %v763_v12 = vpop.f32.mrf.mxu0 }
  0xfb   : > { %v799_v16 = vadd.f32 %v763_v12, %v682_v18  ;;  %v892_v18 = vpop.f32.mrf.mxu1 }
  0xfd   : > { %2443 = vmatmul.msk.f32.gmra.mxu0 %vm273_vm1, %v2923_v47 }
  0xfe   : > { %v1007_v14 = vpop.f32.mrf.mxu2 }
 0x101   : > { %v670_v22 = vpop.f32.mrf.mxu3 }
 0x102   : > { %v690_v19 = vadd.f32 %v670_v22, %v572_v61  ;;  %v766_v20 = vpop.f32.mrf.mxu0  ;;  %v916_v61 = vadd.f32 %v880_v44, %v799_v16 }
 0x103   : > { %v800_v48 = vadd.f32 %v766_v20, %v683_v37  ;;  %v895_v25 = vpop.f32.mrf.mxu1 }
 0x105   : > { %2444 = vmatmul.msk.f32.gmra.mxu0 %vm273_vm1, %v2431_v23 }
 0x106   : > { %v1010_v22 = vpop.f32.mrf.mxu2 }
 0x109   : > { %v673_v52 = vpop.f32.mrf.mxu3 }
 0x10a   : > { %v691_v24 = vadd.f32 %v673_v52, %v573_v0  ;;  %v769_v27 = vpop.f32.mrf.mxu0  ;;  %v1034_v0 = vadd.f32 %v998_v46, %v916_v61 }
 0x10b   : > { %v801_v26 = vadd.f32 %v769_v27, %v684_v49 }
 0x10d   : > { %2445 = vmatmul.msk.f32.gmra.mxu0 %vm273_vm1, %v2844_v34 }
 0x111   : > { %v676_v29 = vpop.f32.mrf.mxu3 }
 0x112   : > { %v692_v47 = vadd.f32 %v676_v29, %v574_v28  ;;  %v772_v30 = vpop.f32.mrf.mxu0 }
 0x113   : > { %v3031_v32 = vadd.f32 %v772_v30, %v685_v60 }
 0x115   : > { %2446 = vmatmul.msk.f32.gmra.mxu0 %vm273_vm1, %v2755_v13 }
 0x119   : > { %v679_v51 = vpop.f32.mrf.mxu3 }
 0x11a   : > { %v693_v36 = vadd.f32 %v679_v51, %v575_v35  ;;  %v775_v37 = vpop.f32.mrf.mxu0 }
 0x11b   : > { %v3036_v38 = vadd.f32 %v775_v37, %v686_v2 }
 0x11d   : > { %2447 = vmatmul.msk.f32.gmra.mxu0 %vm273_vm1, %v2775_v17  ;;  %v920_v51 = vadd.f32 %v892_v18, %v3036_v38 }
 0x121   : > { %v1115_v49 = vpop.f32.mrf.mxu3 }
 0x122   : > { %v778_v34 = vpop.f32.mrf.mxu0  ;;  %v1151_v2 = vadd.f32 %v1115_v49, %v1034_v0 }
 0x123   : > { %v3040_v5 = vadd.f32 %v778_v34, %v687_v4  ;;  %v917_v4 = vadd.f32 %v883_v53, %v800_v48  ;;  %v898_v34 = vpop.f32.mrf.mxu1 }
 0x125   : > { %2448 = vmatmul.msk.f32.gmra.mxu0 %vm273_vm1, %v2795_v21  ;;  %v1035_v7 = vadd.f32 %v1001_v54, %v917_v4 }
 0x129   : > { %v1118_v55 = vpop.f32.mrf.mxu3 }
 0x12a   : > { %v781_v56 = vpop.f32.mrf.mxu0  ;;  %v1152_v43 = vadd.f32 %v1118_v55, %v1035_v7 }
 0x12b   : > { %v3044_v40 = vadd.f32 %v781_v56, %v688_v41  ;;  %v1038_v56 = vadd.f32 %v1010_v22, %v920_v51  ;;  %v901_v38 = vpop.f32.mrf.mxu1 }
 0x12d   : > { %2449 = vmatmul.msk.f32.gmra.mxu0 %vm273_vm1, %v2982_v11 }
 0x131   : > { %v1121_v62 = vpop.f32.mrf.mxu3 }
 0x132   : > { %v784_v13 = vpop.f32.mrf.mxu0 }
 0x133   : > { %v3049_v42 = vadd.f32 %v784_v13, %v689_v10  ;;  %v918_v10 = vadd.f32 %v886_v58, %v801_v26  ;;  %v1013_v26 = vpop.f32.mrf.mxu2  ;;  %v922_v58 = vadd.f32 %v898_v34, %v3044_v40 }
 0x135   : > { %2450 = vmatmul.msk.f32.gmra.mxu0 %vm273_vm1, %v2437_v15  ;;  %v923_v4 = vadd.f32 %v901_v38, %v3049_v42 }
 0x139   : > { %v1124_v63 = vpop.f32.mrf.mxu3 }
 0x13a   : > { %v787_v17 = vpop.f32.mrf.mxu0 }
 0x13b   : > { %v3052_v45 = vadd.f32 %v787_v17, %v690_v19  ;;  %v1036_v19 = vadd.f32 %v1004_v59, %v918_v10  ;;  %v1016_v15 = vpop.f32.mrf.mxu2  ;;  %v921_v17 = vadd.f32 %v895_v25, %v3040_v5 }
 0x13c   : > { %v1040_v0 = vadd.f32 %v1016_v15, %v922_v58 }
 0x13d   : > { %v1153_v48 = vadd.f32 %v1121_v62, %v1036_v19  ;;  %v1039_v53 = vadd.f32 %v1013_v26, %v921_v17 }
 0x141   : > { %v1127_v23 = vpop.f32.mrf.mxu3 }
 0x142   : > { %v790_v50 = vpop.f32.mrf.mxu0  ;;  %v1155_v13 = vadd.f32 %v1127_v23, %v1038_v56 }
 0x143   : > { %v3054_v21 = vadd.f32 %v790_v50, %v691_v24  ;;  %v919_v24 = vadd.f32 %v889_v1, %v3031_v32 }
 0x145   : > { %v1037_v29 = vadd.f32 %v1007_v14, %v919_v24 }
 0x147   : > { %v1154_v30 = vadd.f32 %v1124_v63, %v1037_v29 }
 0x149   : > { %v1130_v31 = vpop.f32.mrf.mxu3 }
 0x14a   : > { %v793_v57 = vpop.f32.mrf.mxu0  ;;  %v1156_v55 = vadd.f32 %v1130_v31, %v1039_v53 }
 0x14b   : > { %v3056_v11 = vadd.f32 %v793_v57, %v692_v47 }
 0x151   : > { %v1133_v49 = vpop.f32.mrf.mxu3 }
 0x152   : > { %v796_v60 = vpop.f32.mrf.mxu0  ;;  %v1157_v1 = vadd.f32 %v1133_v49, %v1040_v0 }
 0x153   : > { %v3058_v33 = vadd.f32 %v796_v60, %v693_v36  ;;  %v1019_v60 = vpop.f32.mrf.mxu2 }
 0x154   : > { %v1041_v63 = vadd.f32 %v1019_v60, %v923_v4 }
 0x159   : > { %v1136_v62 = vpop.f32.mrf.mxu3 }
 0x15a   : > { %v1232_v3 = vpop.f32.mrf.mxu0 }
 0x15b   : > { %v1268_v6 = vadd.f32 %v1232_v3, %v1151_v2  ;;  %v904_v2 = vpop.f32.mrf.mxu1 }
 0x15c   : > { %v924_v18 = vadd.f32 %v904_v2, %v3052_v45 }
 0x15d   : > { %v1284_v41 = vadd.f32 %v3063_v39, %v1268_v6 }
 0x15f   : > { %v1296_v8 = vmax.f32 %v1284_v41, 0.0  ;;  %v1022_v41 = vpop.f32.mrf.mxu2 }
 0x161   : > { %1309 = vst.msk [vmem:[#allocation2 + $0x1] sm:$0xff] %vm1308_vm2, %v1296_v8  ;;  %v1139_v7 = vpop.f32.mrf.mxu3  ;;  %v1158_v8 = vadd.f32 %v1136_v62, %v1041_v63 }
 0x162   : > { %v1235_v9 = vpop.f32.mrf.mxu0 }
 0x163   : > { %v1269_v12 = vadd.f32 %v1235_v9, %v1152_v43  ;;  %v907_v10 = vpop.f32.mrf.mxu1 }
 0x165   : > { %v1285_v16 = vadd.f32 %v3063_v39, %v1269_v12 }
 0x167   : > { %v1297_v20 = vmax.f32 %v1285_v16, 0.0  ;;  %v1042_v16 = vadd.f32 %v1022_v41, %v924_v18  ;;  %v1025_v42 = vpop.f32.mrf.mxu2 }
 0x169   : > { %1310 = vst.msk [vmem:[#allocation2 + $0x11] sm:$0xff] %vm1308_vm2, %v1297_v20  ;;  %v1159_v19 = vadd.f32 %v1139_v7, %v1042_v16  ;;  %v1142_v20 = vpop.f32.mrf.mxu3 }
 0x16a   : > { %v1238_v52 = vpop.f32.mrf.mxu0 }
 0x16b   : > { %v1270_v27 = vadd.f32 %v1238_v52, %v1153_v48  ;;  %v2620_v48 = vmov 0.0   ;;  %v925_v52 = vadd.f32 %v907_v10, %v3054_v21 }
 0x16c   : > { %1322 = vst.msk [vmem:[#allocation2] sm:$0x1] %vm1321_vm3, %v2620_v48 }
 0x16d   : > { %v1286_v28 = vadd.f32 %v3063_v39, %v1270_v27  ;;  %1323 = vst.msk [vmem:[#allocation2 + $0x10] sm:$0x1] %vm1321_vm3, %v2620_v48  ;;  %v910_v27 = vpop.f32.mrf.mxu1  ;;  %v1043_v25 = vadd.f32 %v1025_v42, %v925_v52 }
 0x16e   : > { %1324 = vst.msk [vmem:[#allocation2 + $0x20] sm:$0x1] %vm1321_vm3, %v2620_v48  ;;  %v926_v26 = vadd.f32 %v910_v27, %v3056_v11 }
 0x16f   : > { %v1298_v47 = vmax.f32 %v1286_v28, 0.0  ;;  %1325 = vst.msk [vmem:[#allocation2 + $0x30] sm:$0x1] %vm1321_vm3, %v2620_v48  ;;  %v1160_v29 = vadd.f32 %v1142_v20, %v1043_v25  ;;  %v1028_v21 = vpop.f32.mrf.mxu2 }
 0x170   : > { %1326 = vst.msk [vmem:[#allocation2 + $0x40] sm:$0x1] %vm1321_vm3, %v2620_v48  ;;  %v1044_v51 = vadd.f32 %v1028_v21, %v926_v26 }
 0x171   : > { %1311 = vst.msk [vmem:[#allocation2 + $0x21] sm:$0xff] %vm1308_vm2, %v1298_v47  ;;  %v1145_v31 = vpop.f32.mrf.mxu3 }
 0x172   : > { %v1241_v35 = vpop.f32.mrf.mxu0  ;;  %1327 = vst.msk [vmem:[#allocation2 + $0x50] sm:$0x1] %vm1321_vm3, %v2620_v48  ;;  %v1161_v11 = vadd.f32 %v1145_v31, %v1044_v51 }
 0x173   : > { %v1271_v36 = vadd.f32 %v1241_v35, %v1154_v30  ;;  %1328 = vst.msk [vmem:[#allocation2 + $0x60] sm:$0x1] %vm1321_vm3, %v2620_v48 }
 0x174   : > { %1329 = vst.msk [vmem:[#allocation2 + $0x70] sm:$0x1] %vm1321_vm3, %v2620_v48 }
 0x175   : > { %v1287_v37 = vadd.f32 %v3063_v39, %v1271_v36  ;;  %1330 = vst.msk [vmem:[#allocation2 + $0x80] sm:$0x1] %vm1321_vm3, %v2620_v48 }
 0x176   : > { %1331 = vst.msk [vmem:[#allocation2 + $0x90] sm:$0x1] %vm1321_vm3, %v2620_v48 }
 0x177   : > { %v1299_v32 = vmax.f32 %v1287_v37, 0.0  ;;  %1332 = vst.msk [vmem:[#allocation2 + $0xa0] sm:$0x1] %vm1321_vm3, %v2620_v48  ;;  %v913_v37 = vpop.f32.mrf.mxu1 }
 0x178   : > { %1333 = vst.msk [vmem:[#allocation2 + $0xb0] sm:$0x1] %vm1321_vm3, %v2620_v48  ;;  %v927_v56 = vadd.f32 %v913_v37, %v3058_v33 }
 0x179   : > { %1312 = vst.msk [vmem:[#allocation2 + $0x31] sm:$0xff] %vm1308_vm2, %v1299_v32 }
 0x17a   : > { %v1244_v44 = vpop.f32.mrf.mxu0  ;;  %1334 = vst.msk [vmem:[#allocation2 + $0x9] sm:$0x1] %vm1321_vm3, %v2620_v48 }
 0x17b   : > { %v1272_v46 = vadd.f32 %v1244_v44, %v1155_v13  ;;  %1335 = vst.msk [vmem:[#allocation2 + $0x19] sm:$0x1] %vm1321_vm3, %v2620_v48  ;;  %v1031_v13 = vpop.f32.mrf.mxu2  ;;  %v1148_v44 = vpop.f32.mrf.mxu3 }
 0x17c   : > { %1336 = vst.msk [vmem:[#allocation2 + $0x29] sm:$0x1] %vm1321_vm3, %v2620_v48  ;;  %v1045_v17 = vadd.f32 %v1031_v13, %v927_v56 }
 0x17d   : > { %v1288_v50 = vadd.f32 %v3063_v39, %v1272_v46  ;;  %1337 = vst.msk [vmem:[#allocation2 + $0x39] sm:$0x1] %vm1321_vm3, %v2620_v48 }
 0x17e   : > { %1338 = vst.msk [vmem:[#allocation2 + $0x49] sm:$0x1] %vm1321_vm3, %v2620_v48  ;;  %v1162_v33 = vadd.f32 %v1148_v44, %v1045_v17 }
 0x17f   : > { %v1300_v54 = vmax.f32 %v1288_v50, 0.0  ;;  %1339 = vst.msk [vmem:[#allocation2 + $0x59] sm:$0x1] %vm1321_vm3, %v2620_v48 }
 0x180   : > { %1340 = vst.msk [vmem:[#allocation2 + $0x69] sm:$0x1] %vm1321_vm3, %v2620_v48 }
 0x181   : > { %1313 = vst.msk [vmem:[#allocation2 + $0x41] sm:$0xff] %vm1308_vm2, %v1300_v54 }
 0x182   : > { %v1247_v57 = vpop.f32.mrf.mxu0  ;;  %1341 = vst.msk [vmem:[#allocation2 + $0x79] sm:$0x1] %vm1321_vm3, %v2620_v48 }
 0x183   : > { %v1273_v59 = vadd.f32 %v1247_v57, %v1156_v55  ;;  %1342 = vst.msk [vmem:[#allocation2 + $0x89] sm:$0x1] %vm1321_vm3, %v2620_v48 }
 0x184   : > { %1343 = vst.msk [vmem:[#allocation2 + $0x99] sm:$0x1] %vm1321_vm3, %v2620_v48 }
 0x185   : > { %v1289_v61 = vadd.f32 %v3063_v39, %v1273_v59  ;;  %1344 = vst.msk [vmem:[#allocation2 + $0xa9] sm:$0x1] %vm1321_vm3, %v2620_v48 }
 0x186   : > { %1345 = vst.msk [vmem:[#allocation2 + $0xb9] sm:$0x1] %vm1321_vm3, %v2620_v48 }
 0x187   : > { %v1301_v5 = vmax.f32 %v1289_v61, 0.0 }
 0x189   : > { %1314 = vst.msk [vmem:[#allocation2 + $0x51] sm:$0xff] %vm1308_vm2, %v1301_v5 }
 0x18a   : > { %v1250_v3 = vpop.f32.mrf.mxu0 }
 0x18b   : > { %v1274_v6 = vadd.f32 %v1250_v3, %v1157_v1 }
 0x18d   : > { %v1290_v14 = vadd.f32 %v3063_v39, %v1274_v6 }
 0x18f   : > { %v1302_v40 = vmax.f32 %v1290_v14, 0.0 }
 0x191   : > { %1315 = vst.msk [vmem:[#allocation2 + $0x61] sm:$0xff] %vm1308_vm2, %v1302_v40 }
 0x192   : > { %v1253_v43 = vpop.f32.mrf.mxu0 }
 0x193   : > { %v1275_v9 = vadd.f32 %v1253_v43, %v1158_v8 }
 0x195   : > { %v1291_v12 = vadd.f32 %v3063_v39, %v1275_v9 }
 0x197   : > { %v1303_v22 = vmax.f32 %v1291_v12, 0.0 }
 0x199   : > { %1316 = vst.msk [vmem:[#allocation2 + $0x71] sm:$0xff] %vm1308_vm2, %v1303_v22 }
 0x19a   : > { %v1256_v23 = vpop.f32.mrf.mxu0 }
 0x19b   : > { %v1276_v24 = vadd.f32 %v1256_v23, %v1159_v19 }
 0x19d   : > { %v1292_v45 = vadd.f32 %v3063_v39, %v1276_v24 }
 0x19f   : > { %v1304_v28 = vmax.f32 %v1292_v45, 0.0 }
 0x1a1   : > { %1317 = vst.msk [vmem:[#allocation2 + $0x81] sm:$0xff] %vm1308_vm2, %v1304_v28 }
 0x1a2   : > { %v1259_v47 = vpop.f32.mrf.mxu0 }
 0x1a3   : > { %v1277_v30 = vadd.f32 %v1259_v47, %v1160_v29 }
 0x1a5   : > { %v1293_v35 = vadd.f32 %v3063_v39, %v1277_v30 }
 0x1a7   : > { %v1305_v36 = vmax.f32 %v1293_v35, 0.0 }
 0x1a9   : > { %1318 = vst.msk [vmem:[#allocation2 + $0x91] sm:$0xff] %vm1308_vm2, %v1305_v36 }
 0x1aa   : > { %v1262_v34 = vpop.f32.mrf.mxu0 }
 0x1ab   : > { %v1278_v32 = vadd.f32 %v1262_v34, %v1161_v11 }
 0x1ad   : > { %v1294_v15 = vadd.f32 %v3063_v39, %v1278_v32 }
 0x1af   : > { %v1306_v46 = vmax.f32 %v1294_v15, 0.0 }
 0x1b1   : > { %1319 = vst.msk [vmem:[#allocation2 + $0xa1] sm:$0xff] %vm1308_vm2, %v1306_v46 }
 0x1b2   : > { %v1265_v49 = vpop.f32.mrf.mxu0 }
 0x1b3   : > { %v1279_v50 = vadd.f32 %v1265_v49, %v1162_v33 }
 0x1b5   : > { %v1295_v53 = vadd.f32 %v3063_v39, %v1279_v50  ;;  %1349 = sbr.rel (%p2451_p9) target bundleno = 447 (0x1bf), region = 44 }
 0x1b7   : > { %v1307_v54 = vmax.f32 %v1295_v53, 0.0 }
 0x1b9   : > { %1320 = vst.msk [vmem:[#allocation2 + $0xb1] sm:$0xff] %vm1308_vm2, %v1307_v54 }
 0x1ba   : > { %vm1351_vm4 = vcmask 58368   ;;  %v2621_v38 = vmov 0.0  }
 0x1bb   : > { %1350 = vst.msk [vmem:[#allocation2] sm:$0xff] %vm1308_vm2, %v2621_v38 }
 0x1bc   : > { %1353 = vst.msk [vmem:[#allocation2 + $0x60] sm:$0xff] %vm1308_vm2, %v2621_v38 }
 0x1bd   : > { %1352 = vst.msk [vmem:[#allocation2 + $0x8] sm:$0x3] %vm1351_vm4, %v2621_v38 }
 0x1be   : > { %1354 = vst.msk [vmem:[#allocation2 + $0x68] sm:$0x3] %vm1351_vm4, %v2621_v38 }
 0x1bf PF: > { %p2452_p10 = scmp.ne.s32.totalorder %s2610_s20, 1 }
 0x1c1   : > { %1358 = sbr.rel (%p2452_p10) target bundleno = 459 (0x1cb), region = 48 }
 0x1c6   : > { %vm1361_vm5 = vcmask 58368   ;;  %v2622_v39 = vmov 0.0  }
 0x1c7   : > { %1360 = vst.msk [vmem:[#allocation2 + $0x50] sm:$0xff] %vm1308_vm2, %v2622_v39 }
 0x1c8   : > { %1363 = vst.msk [vmem:[#allocation2 + $0xb0] sm:$0xff] %vm1308_vm2, %v2622_v39 }
 0x1c9   : > { %1362 = vst.msk [vmem:[#allocation2 + $0x58] sm:$0x3] %vm1361_vm5, %v2622_v39 }
 0x1ca   : > { %1364 = vst.msk [vmem:[#allocation2 + $0xb8] sm:$0x3] %vm1361_vm5, %v2622_v39 }
 0x1cb PF: > { %v1382_v55 = vld [vmem:[%s3385_s3 + $0x8] sm:$0xff]  ;;  %v1373_v57 = vld [vmem:[%s3385_s3] sm:$0xff]  ;;  %v1521_v61 = vld [vmem:[%s3385_s3 + $0x10] sm:$0xff]  ;;  %s2531_s17 = sshll.u32 (%p2682_p3), %s2610_s20, 5 }
 0x1cc   : > { %v1374_v58 = vld [vmem:[#allocation2 + $0x1] sm:$0xff]  ;;  %1422 = vmatpush.msra.mxu1 %v1382_v55  ;;  %1487 = vmatpush.msra.mxu2 %v1373_v57  ;;  %v1604_v0 = vld [vmem:[%s3385_s3 + $0x18] sm:$0xff]  ;;  %v1366_v1 = vld [vmem:[#allocation2 + $0x10] sm:$0xff]  ;;  %s2129_s25 = scalar_lea.vmem (%p2682_p3), %s3387_s5, %s2531_s17 }
 0x1cd   : > { %v1365_v59 = vld [vmem:[#allocation2] sm:$0xff]  ;;  %2453 = vmatmul.msk.f32.vlgmr.msra.gmra.mxu1 %vm1308_vm2, %v1374_v58  ;;  %1561 = vmatpush.msra.mxu3 %v1521_v61  ;;  %v1375_v5 = vld [vmem:[#allocation2 + $0x11] sm:$0xff]  ;;  %v1768_v40 = vld [vmem:[%s3385_s3 + $0x28] sm:$0xff] }
 0x1ce   : > { %v1686_v60 = vld [vmem:[%s3385_s3 + $0x20] sm:$0xff]  ;;  %2461 = vmatmul.msk.f32.vlgmr.msra.gmra.mxu2 %vm1308_vm2, %v1365_v59  ;;  %1644 = vmatpush.msrb.mxu1 %v1604_v0  ;;  %v1514_v2 = vld [vmem:[#allocation2 + $0x12] sm:$0xff] }
 0x1cf   : > { %v1513_v62 = vld [vmem:[#allocation2 + $0x2] sm:$0xff]  ;;  %1726 = vmatpush.msrb.mxu2 %v1686_v60  ;;  %v3161_v14 = vld [vmem:[#allocation2 + $0x31] sm:$0xff]  ;;  %1808 = vmatpush.msrb.mxu3 %v1768_v40 }
 0x1d0   : > { %2469 = vmatmul.msk.f32.vlgmr.msra.gmra.mxu3 %vm1308_vm2, %v1513_v62  ;;  %v3152_v3 = vld [vmem:[#allocation2 + $0x21] sm:$0xff]  ;;  %v1368_v41 = vld [vmem:[#allocation2 + $0x30] sm:$0xff]  ;;  %v1933_v9 = vld [vmem:[%s3385_s3 + $0x38] sm:$0xff] }
 0x1d1   : > { %v1367_v4 = vld [vmem:[#allocation2 + $0x20] sm:$0xff]  ;;  %v3163_v63 = vld [vmem:[#allocation2 + $0x32] sm:$0xff]  ;;  %1973 = vmatpush.msra.mxu1 %v1933_v9 }
 0x1d2   : > { %v3154_v6 = vld [vmem:[#allocation2 + $0x22] sm:$0xff]  ;;  %v1379_v10 = vld [vmem:[#allocation2 + $0x71] sm:$0xff] }
 0x1d3   : > { %v1378_v7 = vld [vmem:[#allocation2 + $0x61] sm:$0xff]  ;;  %v1370_v12 = vld [vmem:[#allocation2 + $0x70] sm:$0xff] }
 0x1d4   : > { %v1369_v8 = vld [vmem:[#allocation2 + $0x60] sm:$0xff]  ;;  %v1518_v16 = vld [vmem:[#allocation2 + $0x72] sm:$0xff] }
 0x1d5   : > { %2454 = vmatmul.msk.f32.gmra.mxu1 %vm1308_vm2, %v1375_v5  ;;  %v1517_v43 = vld [vmem:[#allocation2 + $0x62] sm:$0xff]  ;;  %v1851_v22 = vld [vmem:[%s3385_s3 + $0x30] sm:$0xff] }
 0x1d6   : > { %2462 = vmatmul.msk.f32.gmra.mxu2 %vm1308_vm2, %v1366_v1  ;;  %v2015_v18 = vld [vmem:[%s3385_s3 + $0x40] sm:$0xff]  ;;  %1891 = vmatpush.msra.mxu0 %v1851_v22  ;;  %v3199_v23 = vld [vmem:[#allocation2 + $0x91] sm:$0xff] }
 0x1d7   : > { %2055 = vmatpush.msra.mxu2 %v2015_v18  ;;  %2501 = vmatmul.msk.f32.vlgmr.msra.gmra.mxu0 %vm1308_vm2, %v1367_v4  ;;  %v3189_v42 = vld [vmem:[#allocation2 + $0x81] sm:$0xff]  ;;  %v1372_v48 = vld [vmem:[#allocation2 + $0x90] sm:$0xff] }
 0x1d8   : > { %2470 = vmatmul.msk.f32.gmra.mxu3 %vm1308_vm2, %v1514_v2  ;;  %v1371_v19 = vld [vmem:[#allocation2 + $0x80] sm:$0xff]  ;;  %v3201_v52 = vld [vmem:[#allocation2 + $0x92] sm:$0xff] }
 0x1d9   : > { %v3191_v20 = vld [vmem:[#allocation2 + $0x82] sm:$0xff]  ;;  %v1846_v45 = vld [vmem:[#allocation2 + $0x50] sm:$0xff] }
 0x1da   : > { %v1599_v24 = vld [vmem:[#allocation2 + $0x40] sm:$0xff]  ;;  %v1850_v29 = vld [vmem:[#allocation2 + $0xb0] sm:$0xff] }
 0x1db   : > { %v1681_v27 = vld [vmem:[#allocation2 + $0x41] sm:$0xff]  ;;  %v1928_v32 = vld [vmem:[#allocation2 + $0x51] sm:$0xff] }
 0x1dc   : > { %v1763_v25 = vld [vmem:[#allocation2 + $0x42] sm:$0xff]  ;;  %v2010_v13 = vld [vmem:[#allocation2 + $0x52] sm:$0xff] }
 0x1dd   : > { %2455 = vmatmul.msk.f32.gmra.mxu1 %vm1308_vm2, %v3152_v3  ;;  %v1603_v28 = vld [vmem:[#allocation2 + $0xa0] sm:$0xff]  ;;  %v1932_v60 = vld [vmem:[#allocation2 + $0xb1] sm:$0xff] }
 0x1de   : > { %2463 = vmatmul.msk.f32.gmra.mxu2 %vm1308_vm2, %v1367_v4  ;;  %v1685_v21 = vld [vmem:[#allocation2 + $0xa1] sm:$0xff]  ;;  %v2014_v61 = vld [vmem:[#allocation2 + $0xb2] sm:$0xff] }
 0x1df   : > { %2502 = vmatmul.msk.f32.gmra.mxu0 %vm1308_vm2, %v1368_v41  ;;  %v1767_v47 = vld [vmem:[#allocation2 + $0xa2] sm:$0xff] }
 0x1e0   : > { %2471 = vmatmul.msk.f32.gmra.mxu3 %vm1308_vm2, %v3154_v6 }
 0x1e5   : > { %2456 = vmatmul.msk.f32.gmra.mxu1 %vm1308_vm2, %v3161_v14 }
 0x1e6   : > { %2464 = vmatmul.msk.f32.gmra.mxu2 %vm1308_vm2, %v1368_v41 }
 0x1e7   : > { %2503 = vmatmul.msk.f32.gmra.mxu0 %vm1308_vm2, %v1599_v24 }
 0x1e8   : > { %2472 = vmatmul.msk.f32.gmra.mxu3 %vm1308_vm2, %v3163_v63 }
 0x1ed   : > { %2457 = vmatmul.msk.f32.gmra.mxu1 %vm1308_vm2, %v1378_v7 }
 0x1ee   : > { %2465 = vmatmul.msk.f32.gmra.mxu2 %vm1308_vm2, %v1369_v8 }
 0x1ef   : > { %2504 = vmatmul.msk.f32.gmra.mxu0 %vm1308_vm2, %v1846_v45 }
 0x1f0   : > { %2473 = vmatmul.msk.f32.gmra.mxu3 %vm1308_vm2, %v1517_v43 }
 0x1f5   : > { %2458 = vmatmul.msk.f32.gmra.mxu1 %vm1308_vm2, %v1379_v10 }
 0x1f6   : > { %2466 = vmatmul.msk.f32.gmra.mxu2 %vm1308_vm2, %v1370_v12 }
 0x1f7   : > { %2505 = vmatmul.msk.f32.gmra.mxu0 %vm1308_vm2, %v1371_v19 }
 0x1f8   : > { %2474 = vmatmul.msk.f32.gmra.mxu3 %vm1308_vm2, %v1518_v16 }
 0x1fd   : > { %2459 = vmatmul.msk.f32.gmra.mxu1 %vm1308_vm2, %v3189_v42 }
 0x1fe   : > { %2467 = vmatmul.msk.f32.gmra.mxu2 %vm1308_vm2, %v1371_v19 }
 0x1ff   : > { %2506 = vmatmul.msk.f32.gmra.mxu0 %vm1308_vm2, %v1372_v48 }
 0x200   : > { %2475 = vmatmul.msk.f32.gmra.mxu3 %vm1308_vm2, %v3191_v20 }
 0x205   : > { %2460 = vmatmul.msk.f32.gmra.mxu1 %vm1308_vm2, %v3199_v23 }
 0x206   : > { %2468 = vmatmul.msk.f32.gmra.mxu2 %vm1308_vm2, %v1372_v48 }
 0x207   : > { %2507 = vmatmul.msk.f32.gmra.mxu0 %vm1308_vm2, %v1603_v28 }
 0x208   : > { %2476 = vmatmul.msk.f32.gmra.mxu3 %vm1308_vm2, %v3201_v52 }
 0x20d   : > { %2477 = vmatmul.msk.f32.vlgmr.msrb.gmra.mxu1 %vm1308_vm2, %v1366_v1 }
 0x20e   : > { %2485 = vmatmul.msk.f32.vlgmr.msrb.gmra.mxu2 %vm1308_vm2, %v1375_v5 }
 0x20f   : > { %2508 = vmatmul.msk.f32.gmra.mxu0 %vm1308_vm2, %v1850_v29 }
 0x210   : > { %2493 = vmatmul.msk.f32.vlgmr.msrb.gmra.mxu3 %vm1308_vm2, %v1514_v2 }
 0x215   : > { %2478 = vmatmul.msk.f32.gmra.mxu1 %vm1308_vm2, %v1367_v4 }
 0x216   : > { %2486 = vmatmul.msk.f32.gmra.mxu2 %vm1308_vm2, %v3152_v3 }
 0x218   : > { %2494 = vmatmul.msk.f32.gmra.mxu3 %vm1308_vm2, %v3154_v6 }
 0x21d   : > { %2479 = vmatmul.msk.f32.gmra.mxu1 %vm1308_vm2, %v1368_v41 }
 0x21e   : > { %2487 = vmatmul.msk.f32.gmra.mxu2 %vm1308_vm2, %v3161_v14 }
 0x220   : > { %2495 = vmatmul.msk.f32.gmra.mxu3 %vm1308_vm2, %v3163_v63 }
 0x225   : > { %2480 = vmatmul.msk.f32.gmra.mxu1 %vm1308_vm2, %v1599_v24 }
 0x226   : > { %2488 = vmatmul.msk.f32.gmra.mxu2 %vm1308_vm2, %v1681_v27 }
 0x228   : > { %2496 = vmatmul.msk.f32.gmra.mxu3 %vm1308_vm2, %v1763_v25 }
 0x22d   : > { %2481 = vmatmul.msk.f32.gmra.mxu1 %vm1308_vm2, %v1370_v12 }
 0x22e   : > { %2489 = vmatmul.msk.f32.gmra.mxu2 %vm1308_vm2, %v1379_v10 }
 0x230   : > { %2497 = vmatmul.msk.f32.gmra.mxu3 %vm1308_vm2, %v1518_v16 }
 0x235   : > { %2482 = vmatmul.msk.f32.gmra.mxu1 %vm1308_vm2, %v1371_v19 }
 0x236   : > { %2490 = vmatmul.msk.f32.gmra.mxu2 %vm1308_vm2, %v3189_v42 }
 0x238   : > { %2498 = vmatmul.msk.f32.gmra.mxu3 %vm1308_vm2, %v3191_v20 }
 0x23d   : > { %2483 = vmatmul.msk.f32.gmra.mxu1 %vm1308_vm2, %v1372_v48 }
 0x23e   : > { %2491 = vmatmul.msk.f32.gmra.mxu2 %vm1308_vm2, %v3199_v23 }
 0x240   : > { %2499 = vmatmul.msk.f32.gmra.mxu3 %vm1308_vm2, %v3201_v52 }
 0x245   : > { %2484 = vmatmul.msk.f32.gmra.mxu1 %vm1308_vm2, %v1603_v28 }
 0x246   : > { %2492 = vmatmul.msk.f32.gmra.mxu2 %vm1308_vm2, %v1685_v21 }
 0x248   : > { %2500 = vmatmul.msk.f32.gmra.mxu3 %vm1308_vm2, %v1767_v47 }
 0x24a   : > { %v1424_v26 = vpop.f32.mrf.mxu1 }
 0x24d   : > { %2509 = vmatmul.msk.f32.vlgmr.msra.gmra.mxu1 %vm1308_vm2, %v3152_v3 }
 0x24e   : > { %2517 = vmatmul.msk.f32.vlgmr.msra.gmra.mxu2 %vm1308_vm2, %v3154_v6 }
 0x251   : > { %v1489_v30 = vpop.f32.mrf.mxu2 }
 0x252   : > { %v3250_v31 = vadd.f32 %v1489_v30, %v1424_v26  ;;  %v1427_v35 = vpop.f32.mrf.mxu1 }
 0x253   : > { %v1563_v15 = vpop.f32.mrf.mxu3 }
 0x255   : > { %2510 = vmatmul.msk.f32.gmra.mxu1 %vm1308_vm2, %v3161_v14 }
 0x256   : > { %2518 = vmatmul.msk.f32.gmra.mxu2 %vm1308_vm2, %v3163_v63 }
 0x259   : > { %v1492_v51 = vpop.f32.mrf.mxu2 }
 0x25a   : > { %v3256_v36 = vadd.f32 %v1492_v51, %v1427_v35  ;;  %v1430_v37 = vpop.f32.mrf.mxu1 }
 0x25b   : > { %v1566_v50 = vpop.f32.mrf.mxu3 }
 0x25d   : > { %2511 = vmatmul.msk.f32.gmra.mxu1 %vm1308_vm2, %v1681_v27 }
 0x25e   : > { %2519 = vmatmul.msk.f32.gmra.mxu2 %vm1308_vm2, %v1763_v25  ;;  %v1588_v25 = vadd.f32 %v1566_v50, %v3256_v36 }
 0x261   : > { %v1495_v11 = vpop.f32.mrf.mxu2 }
 0x262   : > { %v3260_v34 = vadd.f32 %v1495_v11, %v1430_v37  ;;  %v1433_v56 = vpop.f32.mrf.mxu1 }
 0x263   : > { %v1569_v55 = vpop.f32.mrf.mxu3 }
 0x264   : > { %v1589_v11 = vadd.f32 %v1569_v55, %v3260_v34 }
 0x265   : > { %2512 = vmatmul.msk.f32.gmra.mxu1 %vm1308_vm2, %v1928_v32 }
 0x266   : > { %2520 = vmatmul.msk.f32.gmra.mxu2 %vm1308_vm2, %v2010_v13 }
 0x269   : > { %v1498_v44 = vpop.f32.mrf.mxu2 }
 0x26a   : > { %v3264_v17 = vadd.f32 %v1498_v44, %v1433_v56  ;;  %v1436_v46 = vpop.f32.mrf.mxu1 }
 0x26b   : > { %v1572_v62 = vpop.f32.mrf.mxu3 }
 0x26d   : > { %2513 = vmatmul.msk.f32.gmra.mxu1 %vm1308_vm2, %v3189_v42  ;;  %v1893_v42 = vpop.f32.mrf.mxu0 }
 0x26e   : > { %2521 = vmatmul.msk.f32.gmra.mxu2 %vm1308_vm2, %v3191_v20  ;;  %v1587_v20 = vadd.f32 %v1563_v15, %v3250_v31  ;;  %v3311_v31 = vld [vmem:[%s3386_s4] ss:$0 sm:$0xff] }
 0x271   : > { %v1501_v33 = vpop.f32.mrf.mxu2 }
 0x272   : > { %v3270_v49 = vadd.f32 %v1501_v33, %v1436_v46  ;;  %v1439_v53 = vpop.f32.mrf.mxu1 }
 0x273   : > { %v3286_v2 = vpop.f32.mrf.mxu3 }
 0x275   : > { %2514 = vmatmul.msk.f32.gmra.mxu1 %vm1308_vm2, %v3199_v23  ;;  %v1896_v45 = vpop.f32.mrf.mxu0 }
 0x276   : > { %2522 = vmatmul.msk.f32.gmra.mxu2 %vm1308_vm2, %v3201_v52 }
 0x279   : > { %v1504_v54 = vpop.f32.mrf.mxu2 }
 0x27a   : > { %v3276_v38 = vadd.f32 %v1504_v54, %v1439_v53  ;;  %v1442_v39 = vpop.f32.mrf.mxu1 }
 0x27b   : > { %v3288_v14 = vpop.f32.mrf.mxu3 }
 0x27d   : > { %2515 = vmatmul.msk.f32.gmra.mxu1 %vm1308_vm2, %v1685_v21  ;;  %v1899_v51 = vpop.f32.mrf.mxu0 }
 0x27e   : > { %2523 = vmatmul.msk.f32.gmra.mxu2 %vm1308_vm2, %v1767_v47 }
 0x281   : > { %v1507_v57 = vpop.f32.mrf.mxu2 }
 0x282   : > { %v3280_v58 = vadd.f32 %v1507_v57, %v1442_v39  ;;  %v1445_v59 = vpop.f32.mrf.mxu1  ;;  %v1590_v39 = vadd.f32 %v1572_v62, %v3264_v17 }
 0x283   : > { %v3290_v7 = vpop.f32.mrf.mxu3 }
 0x285   : > { %2516 = vmatmul.msk.f32.gmra.mxu1 %vm1308_vm2, %v1932_v60  ;;  %v1902_v34 = vpop.f32.mrf.mxu0 }
 0x286   : > { %2524 = vmatmul.msk.f32.gmra.mxu2 %vm1308_vm2, %v2014_v61 }
 0x289   : > { %v1510_v0 = vpop.f32.mrf.mxu2 }
 0x28a   : > { %v3284_v5 = vadd.f32 %v1510_v0, %v1445_v59  ;;  %v1646_v1 = vpop.f32.mrf.mxu1 }
 0x28b   : > { %v3292_v18 = vpop.f32.mrf.mxu3  ;;  %v1670_v52 = vadd.f32 %v1646_v1, %v1587_v20 }
 0x28d   : > { %v1905_v20 = vpop.f32.mrf.mxu0 }
 0x291   : > { %v1728_v3 = vpop.f32.mrf.mxu2 }
 0x292   : > { %v1649_v4 = vpop.f32.mrf.mxu1  ;;  %v1752_v24 = vadd.f32 %v1728_v3, %v1670_v52 }
 0x293   : > { %v1810_v12 = vpop.f32.mrf.mxu3  ;;  %v1671_v21 = vadd.f32 %v1649_v4, %v1588_v25  ;;  %v1592_v25 = vadd.f32 %v3288_v14, %v3276_v38  ;;  %v1593_v38 = vadd.f32 %v3290_v7, %v3280_v58  ;;  %v1594_v58 = vadd.f32 %v3292_v18, %v3284_v5 }
 0x294   : > { %v1834_v28 = vadd.f32 %v1810_v12, %v1752_v24 }
 0x296   : > { %v1917_v26 = vadd.f32 %v1893_v42, %v1834_v28 }
 0x299   : > { %v1731_v6 = vpop.f32.mrf.mxu2 }
 0x29a   : > { %v1652_v41 = vpop.f32.mrf.mxu1  ;;  %v1753_v30 = vadd.f32 %v1731_v6, %v1671_v21 }
 0x29b   : > { %v1813_v23 = vpop.f32.mrf.mxu3  ;;  %v1672_v13 = vadd.f32 %v1652_v41, %v1589_v11 }
 0x29c   : > { %v1835_v56 = vadd.f32 %v1813_v23, %v1753_v30  ;;  %v1908_v30 = vpop.f32.mrf.mxu0 }
 0x29e   : > { %v1918_v44 = vadd.f32 %v1896_v45, %v1835_v56 }
 0x2a1   : > { %v1734_v63 = vpop.f32.mrf.mxu2 }
 0x2a2   : > { %v1655_v40 = vpop.f32.mrf.mxu1  ;;  %v1754_v46 = vadd.f32 %v1734_v63, %v1672_v13  ;;  %v1591_v63 = vadd.f32 %v3286_v2, %v3270_v49 }
 0x2a3   : > { %v1816_v47 = vpop.f32.mrf.mxu3  ;;  %v1673_v60 = vadd.f32 %v1655_v40, %v1590_v39 }
 0x2a4   : > { %v1836_v57 = vadd.f32 %v1816_v47, %v1754_v46 }
 0x2a6   : > { %v1919_v0 = vadd.f32 %v1899_v51, %v1836_v57 }
 0x2a9   : > { %v1737_v8 = vpop.f32.mrf.mxu2 }
 0x2aa   : > { %v1658_v43 = vpop.f32.mrf.mxu1  ;;  %v1755_v1 = vadd.f32 %v1737_v8, %v1673_v60 }
 0x2ab   : > { %v1819_v50 = vpop.f32.mrf.mxu3  ;;  %v1674_v42 = vadd.f32 %v1658_v43, %v1591_v63 }
 0x2ac   : > { %v1837_v17 = vadd.f32 %v1819_v50, %v1755_v1 }
 0x2ae   : > { %v1920_v23 = vadd.f32 %v1902_v34, %v1837_v17 }
 0x2b1   : > { %v1740_v9 = vpop.f32.mrf.mxu2 }
 0x2b2   : > { %v3294_v10 = vpop.f32.mrf.mxu1  ;;  %v1756_v52 = vadd.f32 %v1740_v9, %v1674_v42 }
 0x2b3   : > { %v1822_v6 = vpop.f32.mrf.mxu3  ;;  %v1675_v43 = vadd.f32 %v3294_v10, %v1592_v25 }
 0x2b4   : > { %v1838_v28 = vadd.f32 %v1822_v6, %v1756_v52 }
 0x2b6   : > { %v1921_v47 = vadd.f32 %v1905_v20, %v1838_v28 }
 0x2b9   : > { %v3296_v16 = vpop.f32.mrf.mxu2 }
 0x2ba   : > { %v3298_v22 = vpop.f32.mrf.mxu1  ;;  %v1757_v9 = vadd.f32 %v3296_v16, %v1675_v43 }
 0x2bb   : > { %v1825_v2 = vpop.f32.mrf.mxu3  ;;  %v1676_v10 = vadd.f32 %v3298_v22, %v1593_v38 }
 0x2bc   : > { %v1839_v14 = vadd.f32 %v1825_v2, %v1757_v9 }
 0x2c1   : > { %v3300_v19 = vpop.f32.mrf.mxu2 }
 0x2c2   : > { %v3303_v48 = vpop.f32.mrf.mxu1  ;;  %v1758_v16 = vadd.f32 %v3300_v19, %v1676_v10 }
 0x2c3   : > { %v1677_v22 = vadd.f32 %v3303_v48, %v1594_v58 }
 0x2c9   : > { %v3305_v27 = vpop.f32.mrf.mxu2 }
 0x2ca   : > { %v1975_v29 = vpop.f32.mrf.mxu1  ;;  %v1759_v19 = vadd.f32 %v3305_v27, %v1677_v22 }
 0x2cb   : > { %v1999_v35 = vadd.f32 %v1975_v29, %v1917_v26 }
 0x2d1   : > { %v2057_v37 = vpop.f32.mrf.mxu2 }
 0x2d2   : > { %v2081_v32 = vadd.f32 %v2057_v37, %v1999_v35  ;;  %v1978_v36 = vpop.f32.mrf.mxu1 }
 0x2d3   : > { %v2000_v53 = vadd.f32 %v1978_v36, %v1918_v44  ;;  %v1922_v36 = vadd.f32 %v1908_v30, %v1839_v14  ;;  %v1911_v44 = vpop.f32.mrf.mxu0 }
 0x2d4   : > { %v2093_v15 = vadd.f32 %v3311_v31, %v2081_v32  ;;  %v1828_v32 = vpop.f32.mrf.mxu3 }
 0x2d5   : > { %v1840_v7 = vadd.f32 %v1828_v32, %v1758_v16 }
 0x2d6   : > { %v2101_v33 = vmax.f32 %v2093_v15, 0.0 }
 0x2d8   : > { %2109 = vst.msk [vmem:[%s3123_s14] sm:$0xff] %vm1308_vm2, %v2101_v33 }
 0x2d9   : > { %v2060_v54 = vpop.f32.mrf.mxu2 }
 0x2da   : > { %v2082_v59 = vadd.f32 %v2060_v54, %v2000_v53  ;;  %v1981_v55 = vpop.f32.mrf.mxu1  ;;  %v1923_v54 = vadd.f32 %v1911_v44, %v1840_v7 }
 0x2db   : > { %v2001_v4 = vadd.f32 %v1981_v55, %v1919_v0  ;;  %v1914_v18 = vpop.f32.mrf.mxu0 }
 0x2dc   : > { %v2094_v61 = vadd.f32 %v3311_v31, %v2082_v59  ;;  %v1831_v57 = vpop.f32.mrf.mxu3 }
 0x2dd   : > { %v1841_v55 = vadd.f32 %v1831_v57, %v1759_v19 }
 0x2de   : > { %v2102_v3 = vmax.f32 %v2094_v61, 0.0 }
 0x2df   : > { %v1924_v48 = vadd.f32 %v1914_v18, %v1841_v55 }
 0x2e0   : > { %2110 = vst.msk [vmem:[%s3123_s14 + $0x8] sm:$0xff] %vm1308_vm2, %v2102_v3 }
 0x2e1   : > { %v2063_v41 = vpop.f32.mrf.mxu2 }
 0x2e2   : > { %v2083_v62 = vadd.f32 %v2063_v41, %v2001_v4  ;;  %v1984_v12 = vpop.f32.mrf.mxu1  ;;  %v2172_v41 = vld [vmem:[%s3123_s14] sm:$0xff] (%p2682_p3) }
 0x2e3   : > { %v2002_v24 = vadd.f32 %v1984_v12, %v1920_v23  ;;  %2173 = vst [vmem:[%s2129_s25] sm:$0xff] (%p2682_p3), %v2172_v41 }
 0x2e4   : > { %v2095_v40 = vadd.f32 %v3311_v31, %v2083_v62 }
 0x2e6   : > { %v2103_v8 = vmax.f32 %v2095_v40, 0.0 }
 0x2e7   : > { %v2174_v63 = vld [vmem:[%s3123_s14 + $0x8] sm:$0xff] (%p2682_p3) }
 0x2e8   : > { %2111 = vst.msk [vmem:[%s3123_s14 + $0x10] sm:$0xff] %vm1308_vm2, %v2103_v8 }
 0x2e9   : > { %v2066_v45 = vpop.f32.mrf.mxu2  ;;  %2175 = vst [vmem:[%s2129_s25 + $0x8] sm:$0xff] (%p2682_p3), %v2174_v63 }
 0x2ea   : > { %v2084_v49 = vadd.f32 %v2066_v45, %v2002_v24  ;;  %v1987_v29 = vpop.f32.mrf.mxu1 }
 0x2eb   : > { %v2003_v35 = vadd.f32 %v1987_v29, %v1921_v47 }
 0x2ec   : > { %v2096_v21 = vadd.f32 %v3311_v31, %v2084_v49 }
 0x2ee   : > { %v2104_v26 = vmax.f32 %v2096_v21, 0.0 }
 0x2f0   : > { %2112 = vst.msk [vmem:[%s3123_s14 + $0x18] sm:$0xff] %vm1308_vm2, %v2104_v26 }
 0x2f1   : > { %v2069_v51 = vpop.f32.mrf.mxu2 }
 0x2f2   : > { %v2085_v37 = vadd.f32 %v2069_v51, %v2003_v35  ;;  %v1990_v11 = vpop.f32.mrf.mxu1 }
 0x2f3   : > { %v2004_v15 = vadd.f32 %v1990_v11, %v1922_v36 }
 0x2f4   : > { %v2097_v56 = vadd.f32 %v3311_v31, %v2085_v37 }
 0x2f6   : > { %v2105_v13 = vmax.f32 %v2097_v56, 0.0 }
 0x2f7   : > { %v2178_v17 = vld [vmem:[%s3123_s14 + $0x18] sm:$0xff] (%p2682_p3) }
 0x2f8   : > { %2113 = vst.msk [vmem:[%s3123_s14 + $0x20] sm:$0xff] %vm1308_vm2, %v2105_v13 }
 0x2f9   : > { %v2072_v46 = vpop.f32.mrf.mxu2  ;;  %2179 = vst [vmem:[%s2129_s25 + $0x18] sm:$0xff] (%p2682_p3), %v2178_v17 }
 0x2fa   : > { %v2086_v33 = vadd.f32 %v2072_v46, %v2004_v15  ;;  %v1993_v50 = vpop.f32.mrf.mxu1 }
 0x2fb   : > { %v2005_v59 = vadd.f32 %v1993_v50, %v1923_v54 }
 0x2fc   : > { %v2098_v53 = vadd.f32 %v3311_v31, %v2086_v33 }
 0x2fe   : > { %v2106_v39 = vmax.f32 %v2098_v53, 0.0 }
 0x2ff   : > { %v2180_v62 = vld [vmem:[%s3123_s14 + $0x20] sm:$0xff] (%p2682_p3) }
 0x300   : > { %2114 = vst.msk [vmem:[%s3123_s14 + $0x28] sm:$0xff] %vm1308_vm2, %v2106_v39 }
 0x301   : > { %v2075_v34 = vpop.f32.mrf.mxu2  ;;  %2181 = vst [vmem:[%s2129_s25 + $0x40] sm:$0xff] (%p2682_p3), %v2180_v62 }
 0x302   : > { %v2087_v5 = vadd.f32 %v2075_v34, %v2005_v59  ;;  %v1996_v61 = vpop.f32.mrf.mxu1 }
 0x303   : > { %v2006_v1 = vadd.f32 %v1996_v61, %v1924_v48 }
 0x304   : > { %v2099_v60 = vadd.f32 %v3311_v31, %v2087_v5 }
 0x306   : > { %v2107_v0 = vmax.f32 %v2099_v60, 0.0 }
 0x307   : > { %v2182_v12 = vld [vmem:[%s3123_s14 + $0x28] sm:$0xff] (%p2682_p3) }
 0x308   : > { %2115 = vst.msk [vmem:[%s3123_s14 + $0x30] sm:$0xff] %vm1308_vm2, %v2107_v0 }
 0x309   : > { %v2078_v3 = vpop.f32.mrf.mxu2  ;;  %2183 = vst [vmem:[%s2129_s25 + $0x48] sm:$0xff] (%p2682_p3), %v2182_v12 }
 0x30a   : > { %v2088_v27 = vadd.f32 %v2078_v3, %v2006_v1 }
 0x30c   : > { %v2100_v4 = vadd.f32 %v3311_v31, %v2088_v27  ;;  %2123 = sbr.rel (!%p2682_p3) target bundleno = 793 (0x319), region = 52  ;;  %v2176_v31 = vld [vmem:[%s3123_s14 + $0x10] sm:$0xff] (%p2682_p3) }
 0x30d   : > { %2177 = vst [vmem:[%s2129_s25 + $0x10] sm:$0xff] (%p2682_p3), %v2176_v31 }
 0x30e   : > { %v2108_v6 = vmax.f32 %v2100_v4, 0.0 }
 0x30f   : > { %v2184_v42 = vld [vmem:[%s3123_s14 + $0x30] sm:$0xff] (%p2682_p3) }
 0x310   : > { %2116 = vst.msk [vmem:[%s3123_s14 + $0x38] sm:$0xff] %vm1308_vm2, %v2108_v6 }
 0x311   : > { %2185 = vst [vmem:[%s2129_s25 + $0x50] sm:$0xff] %v2184_v42 }
 0x317   : > { %v2186_v40 = vld [vmem:[%s3123_s14 + $0x38] sm:$0xff] }
 0x318   : > { %2187 = vst [vmem:[%s2129_s25 + $0x58] sm:$0xff] %v2186_v40 }
 0x319 PF: > { %s15_s22 = sadd.s32 1, %s2618_s22   ;;  %s3389_s18 = smov %s2606_s19 }
 0x31a   : > { %p12_p11 = scmp.ge.s32.totalorder %s15_s22, 4   ;;  %s3390_s19 = smov %s2691_s28 }
 0x31b   : > { %s3391_s20 = smov %s2614_s21  ;;  %s3392_s21 = smov %s3394_s24 }
 0x31c   :  { %14 = sbr.rel (!%p12_p11) target bundleno = 3 (0x3), region = 121 }

</bundles_post_ra>
